<compile_context>
chip_gen: v7x
topology: tpu7x:2x2x1
jax: 0.10.0
libtpu: 0.0.40
codegen_flags: <defaults>
</compile_context>

<pallas_src>
from functools import partial

import jax
import jax.numpy as jnp
from jax import lax
from jax.experimental import pallas as pl
from jax.experimental.pallas import tpu as pltpu


# ----------------------------------------------------------------------------
# Fused Pallas kernel: all EGNN layers + fc in one invocation (grid=(1,))
# ----------------------------------------------------------------------------
def _fused_forward_kernel(*refs, meta, K):
    """refs = [x, (e_exp, idx, W_bf16, b) * num_layers, W_fc_bf16, b_fc, out].

    meta: tuple of (n_src, n_dst, D, A) per layer.  Per layer:
        hg   = onehot(idx) @ h                  # exact row gather at width D (bf16 MXU, f32 acc)
        feat = e_exp * concat([hg]*A)           # feat[:, a*D:(a+1)*D] = e[:,a] * hg   (f32 VPU)
        m    = relu(feat @ W + b)               # one wide-contraction (A*D) MXU matmul
        h'   = mean_k m                         # K-major layout -> pairwise tree of block adds
    """
    nl = len(meta)
    x_ref = refs[0]
    wfc_ref = refs[1 + 4 * nl]
    bfc_ref = refs[2 + 4 * nl]
    o_ref = refs[3 + 4 * nl]

    h = x_ref[...].astype(jnp.float32)                        # resident activations [n_src, D]

    for li, (n_src, n_dst, d, a) in enumerate(meta):
        e_ref, i_ref, w_ref, b_ref = refs[1 + 4 * li: 5 + 4 * li]
        te = K * n_dst

        # (1) gather source rows at width D via exact one-hot bf16 matmul, f32 accumulate.
        # TODO(synk): at production n_src replace this O(te*n_src) one-hot with a
        # scalar-prefetch / SMEM-index row-DMA gather (won't fit v7x's 64 MiB VMEM otherwise).
        lane = lax.broadcasted_iota(jnp.int32, (te, n_src), 1)
        onehot = jnp.where(lane == i_ref[...], 1.0, 0.0).astype(jnp.bfloat16)
        hg = jnp.dot(onehot, h.astype(jnp.bfloat16),
                     preferred_element_type=jnp.float32)               # [te, d]

        # (2) feat[:, a*d:(a+1)*d] = e[:, a] * hg  (e pre-expanded lane-dense in the wrapper,
        #     so no per-a lane extracts here; one lane-concat + one full-width VPU multiply).
        hg_rep = jnp.concatenate([hg] * a, axis=1) if a > 1 else hg    # [te, a*d]
        feat = e_ref[...] * hg_rep                                     # f32 VPU

        # (3) single wide-contraction projection (A*D deep), bf16 MXU, f32 accumulate.
        m = jnp.dot(feat.astype(jnp.bfloat16), w_ref[...],
                    preferred_element_type=jnp.float32) + b_ref[...]
        m = jnp.maximum(m, 0.0)                                        # relu(messages)

        # (4) mean over the K in-edges: K-major layout => K static contiguous row blocks,
        #     reduced with a pairwise tree (depth log2 K) to shorten the dependency chain.
        parts = [m[k * n_dst:(k + 1) * n_dst, :] for k in range(K)]
        while len(parts) > 1:
            nxt = [parts[j] + parts[j + 1] for j in range(0, len(parts) - 1, 2)]
            if len(parts) % 2:
                nxt.append(parts[-1])
            parts = nxt
        # Second ReLU of the original module is mathematically redundant (m >= 0).
        h = parts[0] * (1.0 / K)

    # Final fc, written lane-dense (weights zero-padded to 128 output lanes in the prep step).
    o_ref[...] = (jnp.dot(h.astype(jnp.bfloat16), wfc_ref[...],
                          preferred_element_type=jnp.float32) + bfc_ref[...])


# ----------------------------------------------------------------------------
# One-time (per checkpoint / per minibatch) repacking, hoisted out of the jitted path
# ----------------------------------------------------------------------------
def prepare_params(params, c_pad=128):
    """Cast weights to bf16 and zero-pad fc to 128 output lanes. Static per checkpoint."""
    c = params["fc_W"].shape[1]
    return {
        "node_W": [w.astype(jnp.bfloat16) for w in params["node_W"]],
        "node_b": [b.reshape(1, -1).astype(jnp.float32) for b in params["node_b"]],
        "fc_W": jnp.pad(params["fc_W"], ((0, 0), (0, c_pad - c))).astype(jnp.bfloat16),
        "fc_b": jnp.pad(params["fc_b"].reshape(1, -1),
                        ((0, 0), (0, c_pad - c))).astype(jnp.float32),
    }


def prepare_edges(blocks, src_dims):
    """K-major flatten + lane-dense expansion of edge features.

    blocks[i] = (edge_feats [Nd, K, A], src_idx [Nd, K]); src_dims[i] = source feature dim D.
    Returns per block: (e_exp [K*Nd, A*D] f32 with e_exp[:, a*D:(a+1)*D] = e[:, a],
                        idx   [K*Nd, 1]  int32), row k*Nd + n == edge slot k of dst n.
    """
    # TODO(synk): at production edge counts produce this layout upstream (or expand
    # in-kernel) to avoid the D-fold HBM inflation and the extra transpose pass.
    out = []
    for (e, src_idx), d in zip(blocks, src_dims):
        n_dst, k, a = e.shape
        te = n_dst * k
        e_km = jnp.transpose(e, (1, 0, 2)).reshape(te, a)
        e_exp = jnp.repeat(e_km, d, axis=1).astype(jnp.float32)        # [te, a*d]
        idx_km = jnp.transpose(src_idx, (1, 0)).reshape(te, 1).astype(jnp.int32)
        out.append((e_exp, idx_km))
    return out


# ----------------------------------------------------------------------------
# Jitted wrapper
# ----------------------------------------------------------------------------
def minibatch_egnn_infer(node_features, edge_inputs, prepped, *, K, num_class):
    """node_features: [N0, D0] f32; edge_inputs from prepare_edges; prepped from prepare_params."""
    H = prepped["node_W"][0].shape[1]
    C_PAD = prepped["fc_W"].shape[1]

    inputs = [node_features]
    in_specs = [pl.BlockSpec(node_features.shape, lambda i: (0, 0))]
    meta = []

    n_src = node_features.shape[0]
    d = node_features.shape[1]
    for li, (e_exp, idx) in enumerate(edge_inputs):
        te, ad = e_exp.shape
        a = ad // d
        n_dst = te // K
        w = prepped["node_W"][li]
        b = prepped["node_b"][li]
        inputs += [e_exp, idx, w, b]
        in_specs += [
            pl.BlockSpec(e_exp.shape, lambda i: (0, 0)),
            pl.BlockSpec(idx.shape, lambda i: (0, 0)),
            pl.BlockSpec(w.shape, lambda i: (0, 0)),
            pl.BlockSpec(b.shape, lambda i: (0, 0)),
        ]
        meta.append((n_src, n_dst, d, a))
        n_src, d = n_dst, H

    inputs += [prepped["fc_W"], prepped["fc_b"]]
    in_specs += [pl.BlockSpec(prepped["fc_W"].shape, lambda i: (0, 0)),
                 pl.BlockSpec(prepped["fc_b"].shape, lambda i: (0, 0))]

    n_out = meta[-1][1]
    kernel = partial(_fused_forward_kernel, meta=tuple(meta), K=K)
    # TODO(synk): at production sizes tile the edge dimension (whole K-groups per tile) as a
    # "parallel" grid axis with Buffered(2-3) edge BlockSpecs so v7x's second TensorCore and
    # DMA/compute overlap are used; grid=(1,) is fine at these toy, fully-VMEM-resident sizes.
    out = pl.pallas_call(
        kernel,
        out_shape=jax.ShapeDtypeStruct((n_out, C_PAD), jnp.float32),
        grid=(1,),
        in_specs=in_specs,
        out_specs=pl.BlockSpec((n_out, C_PAD), lambda i: (0, 0)),
        compiler_params=pltpu.CompilerParams(
            dimension_semantics=("arbitrary",),
            vmem_limit_bytes=32 * 1024 * 1024),
    )(*inputs)
    return out[:, :num_class]


# ----------------------------------------------------------------------------
# Deterministic parameter init (PyTorch nn.Linear default: U(-1/sqrt(in), 1/sqrt(in)))
# ----------------------------------------------------------------------------
def init_params(key, node_in_dim, edge_in_dim, node_hidden_dim, num_class, num_layers):
    params = {"node_W": [], "node_b": []}
    for i in range(num_layers):
        in_dim = edge_in_dim * (node_in_dim if i == 0 else node_hidden_dim)
        key, k1, k2 = jax.random.split(key, 3)
        bound = 1.0 / float(in_dim) ** 0.5
        params["node_W"].append(jax.random.uniform(
            k1, (in_dim, node_hidden_dim), jnp.float32, -bound, bound))
        params["node_b"].append(jax.random.uniform(
            k2, (node_hidden_dim,), jnp.float32, -bound, bound))
    key, k1, k2 = jax.random.split(key, 3)
    bound = 1.0 / float(node_hidden_dim) ** 0.5
    params["fc_W"] = jax.random.uniform(
        k1, (node_hidden_dim, num_class), jnp.float32, -bound, bound)
    params["fc_b"] = jax.random.uniform(k2, (num_class,), jnp.float32, -bound, bound)
    return params


# ----------------------------------------------------------------------------
# Pure-JAX references
# ----------------------------------------------------------------------------
def reference_f32(node_features, blocks, params):
    """Exact f32 mirror of the PyTorch forward (dst-major mailbox)."""
    h = node_features
    for i, (e, src_idx) in enumerate(blocks):
        n_dst, K, A = e.shape
        hg = h[src_idx.reshape(-1)]                               # [Nd*K, D]
        D = hg.shape[1]
        e2 = e.reshape(n_dst * K, A)
        feat = (e2[:, :, None] * hg[:, None, :]).reshape(n_dst * K, A * D)
        m = jax.nn.relu(feat @ params["node_W"][i] + params["node_b"][i])
        h = jax.nn.relu(m.reshape(n_dst, K, -1).mean(axis=1))
    return h @ params["fc_W"] + params["fc_b"]


def reference_bf16(node_features, blocks, params):
    """Same math with the kernel's bf16-matmul / f32-accumulate casting points."""
    h = node_features
    for i, (e, src_idx) in enumerate(blocks):
        n_dst, K, A = e.shape
        hb = h.astype(jnp.bfloat16).astype(jnp.float32)
        hg = hb[src_idx.reshape(-1)]
        D = hg.shape[1]
        e2 = e.reshape(n_dst * K, A)
        feat = (e2[:, :, None] * hg[:, None, :]).reshape(n_dst * K, A * D)
        m = jax.nn.relu(
            jnp.dot(feat.astype(jnp.bfloat16),
                    params["node_W"][i].astype(jnp.bfloat16),
                    preferred_element_type=jnp.float32) + params["node_b"][i])
        h = m.reshape(n_dst, K, -1).mean(axis=1)
    return (jnp.dot(h.astype(jnp.bfloat16), params["fc_W"].astype(jnp.bfloat16),
                    preferred_element_type=jnp.float32) + params["fc_b"])


# ----------------------------------------------------------------------------
if __name__ == "__main__":
    node_in_dim = 16
    edge_in_dim = 4
    node_hidden_dim = 32
    num_class = 8
    num_layers = 2
    K = 8                       # fixed sampled fan-in per destination node
    layer_sizes = [64, 32, 16]  # NodeFlow layer node counts (seeds = 16)

    key = jax.random.PRNGKey(0)
    key, kp = jax.random.split(key)
    params = init_params(kp, node_in_dim, edge_in_dim, node_hidden_dim,
                         num_class, num_layers)

    key, kx = jax.random.split(key)
    node_features = jax.random.normal(kx, (layer_sizes[0], node_in_dim), jnp.float32)

    blocks = []
    for i in range(num_layers):
        n_src, n_dst = layer_sizes[i], layer_sizes[i + 1]
        key, ke, ki = jax.random.split(key, 3)
        edge_feats = jax.random.normal(ke, (n_dst, K, edge_in_dim), jnp.float32)
        src_idx = jax.random.randint(ki, (n_dst, K), 0, n_src, jnp.int32)
        blocks.append((edge_feats, src_idx))

    # Static repacking hoisted out of the jitted per-call path.
    src_dims = [node_in_dim] + [node_hidden_dim] * (num_layers - 1)
    prepped = prepare_params(params)
    edge_inputs = prepare_edges(blocks, src_dims)

    run = jax.jit(partial(minibatch_egnn_infer, K=K, num_class=num_class))
    out = run(node_features, edge_inputs, prepped)
    out = jax.block_until_ready(out)

    ref_b = reference_bf16(node_features, blocks, params)   # matches kernel numerics
    ref_f = reference_f32(node_features, blocks, params)    # exact module semantics
    assert out.shape == (layer_sizes[-1], num_class), out.shape
    assert jnp.allclose(out, ref_b, atol=2e-3, rtol=2e-3), \
        float(jnp.max(jnp.abs(out - ref_b)))
    assert jnp.allclose(out, ref_f, atol=5e-2, rtol=5e-2), \
        float(jnp.max(jnp.abs(out - ref_f)))

    print("KERNEL_OK")
</pallas_src>

<mosaic_0001>
module attributes {stable_mosaic.version = 11 : i64} {
  func.func @_fused_forward_kernel(%arg0: i32, %arg1: memref<64x16xf32, #tpu.memory_space<vmem>>, %arg2: memref<256x64xf32, #tpu.memory_space<vmem>>, %arg3: memref<256x1xi32, #tpu.memory_space<vmem>>, %arg4: memref<64x32xbf16, #tpu.memory_space<vmem>>, %arg5: memref<1x32xf32, #tpu.memory_space<vmem>>, %arg6: memref<128x128xf32, #tpu.memory_space<vmem>>, %arg7: memref<128x1xi32, #tpu.memory_space<vmem>>, %arg8: memref<128x32xbf16, #tpu.memory_space<vmem>>, %arg9: memref<1x32xf32, #tpu.memory_space<vmem>>, %arg10: memref<32x128xbf16, #tpu.memory_space<vmem>>, %arg11: memref<1x128xf32, #tpu.memory_space<vmem>>, %arg12: memref<16x128xf32, #tpu.memory_space<vmem>>) attributes {dimension_semantics = [#tpu.dimension_semantics<arbitrary>], iteration_bounds = array<i64: 1>, scalar_prefetch = 0 : i64, scratch_operands = 0 : i64, tpu.core_type = #tpu.core_type<tc>, window_params = [{pipeline_mode = #tpu.pipeline_mode<synchronous>, transform_indices = @transform_0, window_bounds = array<i64: 64, 16>}, {pipeline_mode = #tpu.pipeline_mode<synchronous>, transform_indices = @transform_1, window_bounds = array<i64: 256, 64>}, {pipeline_mode = #tpu.pipeline_mode<synchronous>, transform_indices = @transform_2, window_bounds = array<i64: 256, 1>}, {pipeline_mode = #tpu.pipeline_mode<synchronous>, transform_indices = @transform_3, window_bounds = array<i64: 64, 32>}, {pipeline_mode = #tpu.pipeline_mode<synchronous>, transform_indices = @transform_4, window_bounds = array<i64: 1, 32>}, {pipeline_mode = #tpu.pipeline_mode<synchronous>, transform_indices = @transform_5, window_bounds = array<i64: 128, 128>}, {pipeline_mode = #tpu.pipeline_mode<synchronous>, transform_indices = @transform_6, window_bounds = array<i64: 128, 1>}, {pipeline_mode = #tpu.pipeline_mode<synchronous>, transform_indices = @transform_7, window_bounds = array<i64: 128, 32>}, {pipeline_mode = #tpu.pipeline_mode<synchronous>, transform_indices = @transform_8, window_bounds = array<i64: 1, 32>}, {pipeline_mode = #tpu.pipeline_mode<synchronous>, transform_indices = @transform_9, window_bounds = array<i64: 32, 128>}, {pipeline_mode = #tpu.pipeline_mode<synchronous>, transform_indices = @transform_10, window_bounds = array<i64: 1, 128>}, {pipeline_mode = #tpu.pipeline_mode<synchronous>, transform_indices = @transform_11, window_bounds = array<i64: 16, 128>}]} {
    %c0 = arith.constant 0 : index
    %c0_0 = arith.constant 0 : index
    %0 = vector.load %arg1[%c0, %c0_0] : memref<64x16xf32, #tpu.memory_space<vmem>>, vector<64x16xf32>
    %1 = tpu.iota {dimensions = array<i32: 1>} : vector<256x64xi32>
    %c0_1 = arith.constant 0 : index
    %c0_2 = arith.constant 0 : index
    %2 = vector.load %arg3[%c0_1, %c0_2] : memref<256x1xi32, #tpu.memory_space<vmem>>, vector<256x1xi32>
    %3 = vector.broadcast %2 : vector<256x1xi32> to vector<256x64xi32>
    %4 = arith.cmpi eq, %1, %3 : vector<256x64xi32>
    %cst = arith.constant 1.000000e+00 : f32
    %cst_3 = arith.constant 0.000000e+00 : f32
    %5 = vector.broadcast %cst : f32 to vector<256x64xf32>
    %6 = vector.broadcast %cst_3 : f32 to vector<256x64xf32>
    %7 = arith.select %4, %5, %6 : vector<256x64xi1>, vector<256x64xf32>
    %8 = arith.truncf %7 : vector<256x64xf32> to vector<256x64xbf16>
    %9 = arith.truncf %0 : vector<64x16xf32> to vector<64x16xbf16>
    %cst_4 = arith.constant dense<0.000000e+00> : vector<256x16xf32>
    %10 = tpu.matmul %8, %9, %cst_4 {dimension_numbers = #tpu.dot_dimension_numbers<[1], [0], [0], [1], [0, 0, 1, 1], [], []>} : vector<256x64xbf16>, vector<64x16xbf16>, vector<256x16xf32> -> vector<256x16xf32>
    %11 = tpu.concatenate %10, %10, %10, %10 in 1 : vector<256x16xf32>, vector<256x16xf32>, vector<256x16xf32>, vector<256x16xf32> -> vector<256x64xf32>
    %c0_5 = arith.constant 0 : index
    %c0_6 = arith.constant 0 : index
    %12 = vector.load %arg2[%c0_5, %c0_6] : memref<256x64xf32, #tpu.memory_space<vmem>>, vector<256x64xf32>
    %13 = arith.mulf %12, %11 : vector<256x64xf32>
    %14 = arith.truncf %13 : vector<256x64xf32> to vector<256x64xbf16>
    %c0_7 = arith.constant 0 : index
    %c0_8 = arith.constant 0 : index
    %15 = vector.load %arg4[%c0_7, %c0_8] : memref<64x32xbf16, #tpu.memory_space<vmem>>, vector<64x32xbf16>
    %cst_9 = arith.constant dense<0.000000e+00> : vector<256x32xf32>
    %16 = tpu.matmul %14, %15, %cst_9 {dimension_numbers = #tpu.dot_dimension_numbers<[1], [0], [0], [1], [0, 0, 1, 1], [], []>} : vector<256x64xbf16>, vector<64x32xbf16>, vector<256x32xf32> -> vector<256x32xf32>
    %c0_10 = arith.constant 0 : index
    %c0_11 = arith.constant 0 : index
    %17 = vector.load %arg5[%c0_10, %c0_11] : memref<1x32xf32, #tpu.memory_space<vmem>>, vector<1x32xf32>
    %18 = vector.broadcast %17 : vector<1x32xf32> to vector<256x32xf32>
    %19 = arith.addf %16, %18 : vector<256x32xf32>
    %cst_12 = arith.constant 0.000000e+00 : f32
    %20 = vector.broadcast %cst_12 : f32 to vector<256x32xf32>
    %21 = arith.maximumf %19, %20 : vector<256x32xf32>
    %22 = vector.extract_strided_slice %21 {offsets = [0, 0], sizes = [32, 32], strides = [1, 1]} : vector<256x32xf32> to vector<32x32xf32>
    %23 = vector.extract_strided_slice %21 {offsets = [32, 0], sizes = [32, 32], strides = [1, 1]} : vector<256x32xf32> to vector<32x32xf32>
    %24 = vector.extract_strided_slice %21 {offsets = [64, 0], sizes = [32, 32], strides = [1, 1]} : vector<256x32xf32> to vector<32x32xf32>
    %25 = vector.extract_strided_slice %21 {offsets = [96, 0], sizes = [32, 32], strides = [1, 1]} : vector<256x32xf32> to vector<32x32xf32>
    %26 = vector.extract_strided_slice %21 {offsets = [128, 0], sizes = [32, 32], strides = [1, 1]} : vector<256x32xf32> to vector<32x32xf32>
    %27 = vector.extract_strided_slice %21 {offsets = [160, 0], sizes = [32, 32], strides = [1, 1]} : vector<256x32xf32> to vector<32x32xf32>
    %28 = vector.extract_strided_slice %21 {offsets = [192, 0], sizes = [32, 32], strides = [1, 1]} : vector<256x32xf32> to vector<32x32xf32>
    %29 = vector.extract_strided_slice %21 {offsets = [224, 0], sizes = [32, 32], strides = [1, 1]} : vector<256x32xf32> to vector<32x32xf32>
    %30 = arith.addf %22, %23 : vector<32x32xf32>
    %31 = arith.addf %24, %25 : vector<32x32xf32>
    %32 = arith.addf %26, %27 : vector<32x32xf32>
    %33 = arith.addf %28, %29 : vector<32x32xf32>
    %34 = arith.addf %30, %31 : vector<32x32xf32>
    %35 = arith.addf %32, %33 : vector<32x32xf32>
    %36 = arith.addf %34, %35 : vector<32x32xf32>
    %cst_13 = arith.constant 1.250000e-01 : f32
    %37 = vector.broadcast %cst_13 : f32 to vector<32x32xf32>
    %38 = arith.mulf %36, %37 : vector<32x32xf32>
    %39 = tpu.iota {dimensions = array<i32: 1>} : vector<128x32xi32>
    %c0_14 = arith.constant 0 : index
    %c0_15 = arith.constant 0 : index
    %40 = vector.load %arg7[%c0_14, %c0_15] : memref<128x1xi32, #tpu.memory_space<vmem>>, vector<128x1xi32>
    %41 = vector.broadcast %40 : vector<128x1xi32> to vector<128x32xi32>
    %42 = arith.cmpi eq, %39, %41 : vector<128x32xi32>
    %cst_16 = arith.constant 1.000000e+00 : f32
    %cst_17 = arith.constant 0.000000e+00 : f32
    %43 = vector.broadcast %cst_16 : f32 to vector<128x32xf32>
    %44 = vector.broadcast %cst_17 : f32 to vector<128x32xf32>
    %45 = arith.select %42, %43, %44 : vector<128x32xi1>, vector<128x32xf32>
    %46 = arith.truncf %45 : vector<128x32xf32> to vector<128x32xbf16>
    %47 = arith.truncf %38 : vector<32x32xf32> to vector<32x32xbf16>
    %cst_18 = arith.constant dense<0.000000e+00> : vector<128x32xf32>
    %48 = tpu.matmul %46, %47, %cst_18 {dimension_numbers = #tpu.dot_dimension_numbers<[1], [0], [0], [1], [0, 0, 1, 1], [], []>} : vector<128x32xbf16>, vector<32x32xbf16>, vector<128x32xf32> -> vector<128x32xf32>
    %49 = tpu.concatenate %48, %48, %48, %48 in 1 : vector<128x32xf32>, vector<128x32xf32>, vector<128x32xf32>, vector<128x32xf32> -> vector<128x128xf32>
    %c0_19 = arith.constant 0 : index
    %c0_20 = arith.constant 0 : index
    %50 = vector.load %arg6[%c0_19, %c0_20] : memref<128x128xf32, #tpu.memory_space<vmem>>, vector<128x128xf32>
    %51 = arith.mulf %50, %49 : vector<128x128xf32>
    %52 = arith.truncf %51 : vector<128x128xf32> to vector<128x128xbf16>
    %c0_21 = arith.constant 0 : index
    %c0_22 = arith.constant 0 : index
    %53 = vector.load %arg8[%c0_21, %c0_22] : memref<128x32xbf16, #tpu.memory_space<vmem>>, vector<128x32xbf16>
    %cst_23 = arith.constant dense<0.000000e+00> : vector<128x32xf32>
    %54 = tpu.matmul %52, %53, %cst_23 {dimension_numbers = #tpu.dot_dimension_numbers<[1], [0], [0], [1], [0, 0, 1, 1], [], []>} : vector<128x128xbf16>, vector<128x32xbf16>, vector<128x32xf32> -> vector<128x32xf32>
    %c0_24 = arith.constant 0 : index
    %c0_25 = arith.constant 0 : index
    %55 = vector.load %arg9[%c0_24, %c0_25] : memref<1x32xf32, #tpu.memory_space<vmem>>, vector<1x32xf32>
    %56 = vector.broadcast %55 : vector<1x32xf32> to vector<128x32xf32>
    %57 = arith.addf %54, %56 : vector<128x32xf32>
    %cst_26 = arith.constant 0.000000e+00 : f32
    %58 = vector.broadcast %cst_26 : f32 to vector<128x32xf32>
    %59 = arith.maximumf %57, %58 : vector<128x32xf32>
    %60 = vector.extract_strided_slice %59 {offsets = [0, 0], sizes = [16, 32], strides = [1, 1]} : vector<128x32xf32> to vector<16x32xf32>
    %61 = vector.extract_strided_slice %59 {offsets = [16, 0], sizes = [16, 32], strides = [1, 1]} : vector<128x32xf32> to vector<16x32xf32>
    %62 = vector.extract_strided_slice %59 {offsets = [32, 0], sizes = [16, 32], strides = [1, 1]} : vector<128x32xf32> to vector<16x32xf32>
    %63 = vector.extract_strided_slice %59 {offsets = [48, 0], sizes = [16, 32], strides = [1, 1]} : vector<128x32xf32> to vector<16x32xf32>
    %64 = vector.extract_strided_slice %59 {offsets = [64, 0], sizes = [16, 32], strides = [1, 1]} : vector<128x32xf32> to vector<16x32xf32>
    %65 = vector.extract_strided_slice %59 {offsets = [80, 0], sizes = [16, 32], strides = [1, 1]} : vector<128x32xf32> to vector<16x32xf32>
    %66 = vector.extract_strided_slice %59 {offsets = [96, 0], sizes = [16, 32], strides = [1, 1]} : vector<128x32xf32> to vector<16x32xf32>
    %67 = vector.extract_strided_slice %59 {offsets = [112, 0], sizes = [16, 32], strides = [1, 1]} : vector<128x32xf32> to vector<16x32xf32>
    %68 = arith.addf %60, %61 : vector<16x32xf32>
    %69 = arith.addf %62, %63 : vector<16x32xf32>
    %70 = arith.addf %64, %65 : vector<16x32xf32>
    %71 = arith.addf %66, %67 : vector<16x32xf32>
    %72 = arith.addf %68, %69 : vector<16x32xf32>
    %73 = arith.addf %70, %71 : vector<16x32xf32>
    %74 = arith.addf %72, %73 : vector<16x32xf32>
    %cst_27 = arith.constant 1.250000e-01 : f32
    %75 = vector.broadcast %cst_27 : f32 to vector<16x32xf32>
    %76 = arith.mulf %74, %75 : vector<16x32xf32>
    %77 = arith.truncf %76 : vector<16x32xf32> to vector<16x32xbf16>
    %c0_28 = arith.constant 0 : index
    %c0_29 = arith.constant 0 : index
    %78 = vector.load %arg10[%c0_28, %c0_29] : memref<32x128xbf16, #tpu.memory_space<vmem>>, vector<32x128xbf16>
    %cst_30 = arith.constant dense<0.000000e+00> : vector<16x128xf32>
    %79 = tpu.matmul %77, %78, %cst_30 {dimension_numbers = #tpu.dot_dimension_numbers<[1], [0], [0], [1], [0, 0, 1, 1], [], []>} : vector<16x32xbf16>, vector<32x128xbf16>, vector<16x128xf32> -> vector<16x128xf32>
    %c0_31 = arith.constant 0 : index
    %c0_32 = arith.constant 0 : index
    %80 = vector.load %arg11[%c0_31, %c0_32] : memref<1x128xf32, #tpu.memory_space<vmem>>, vector<1x128xf32>
    %81 = vector.broadcast %80 : vector<1x128xf32> to vector<16x128xf32>
    %82 = arith.addf %79, %81 : vector<16x128xf32>
    %c0_33 = arith.constant 0 : index
    %c0_34 = arith.constant 0 : index
    %83 = vector.load %arg12[%c0_33, %c0_34] : memref<16x128xf32, #tpu.memory_space<vmem>>, vector<16x128xf32>
    tpu.vector_store %arg12[%c0_33, %c0_34], %82 {strides = array<i32>} : memref<16x128xf32, #tpu.memory_space<vmem>>, vector<16x128xf32>,
    return
  }
  func.func @transform_0(%arg0: i32) -> (i32, i32) {
    %c0_i32 = arith.constant 0 : i32
    %c0_i32_0 = arith.constant 0 : i32
    %c0_i32_1 = arith.constant 0 : i32
    return %c0_i32, %c0_i32_0 : i32, i32
  }
  func.func @transform_1(%arg0: i32) -> (i32, i32) {
    %c0_i32 = arith.constant 0 : i32
    %c0_i32_0 = arith.constant 0 : i32
    %c0_i32_1 = arith.constant 0 : i32
    return %c0_i32, %c0_i32_0 : i32, i32
  }
  func.func @transform_2(%arg0: i32) -> (i32, i32) {
    %c0_i32 = arith.constant 0 : i32
    %c0_i32_0 = arith.constant 0 : i32
    %c0_i32_1 = arith.constant 0 : i32
    return %c0_i32, %c0_i32_0 : i32, i32
  }
  func.func @transform_3(%arg0: i32) -> (i32, i32) {
    %c0_i32 = arith.constant 0 : i32
    %c0_i32_0 = arith.constant 0 : i32
    %c0_i32_1 = arith.constant 0 : i32
    return %c0_i32, %c0_i32_0 : i32, i32
  }
  func.func @transform_4(%arg0: i32) -> (i32, i32) {
    %c0_i32 = arith.constant 0 : i32
    %c0_i32_0 = arith.constant 0 : i32
    %c0_i32_1 = arith.constant 0 : i32
    return %c0_i32, %c0_i32_0 : i32, i32
  }
  func.func @transform_5(%arg0: i32) -> (i32, i32) {
    %c0_i32 = arith.constant 0 : i32
    %c0_i32_0 = arith.constant 0 : i32
    %c0_i32_1 = arith.constant 0 : i32
    return %c0_i32, %c0_i32_0 : i32, i32
  }
  func.func @transform_6(%arg0: i32) -> (i32, i32) {
    %c0_i32 = arith.constant 0 : i32
    %c0_i32_0 = arith.constant 0 : i32
    %c0_i32_1 = arith.constant 0 : i32
    return %c0_i32, %c0_i32_0 : i32, i32
  }
  func.func @transform_7(%arg0: i32) -> (i32, i32) {
    %c0_i32 = arith.constant 0 : i32
    %c0_i32_0 = arith.constant 0 : i32
    %c0_i32_1 = arith.constant 0 : i32
    return %c0_i32, %c0_i32_0 : i32, i32
  }
  func.func @transform_8(%arg0: i32) -> (i32, i32) {
    %c0_i32 = arith.constant 0 : i32
    %c0_i32_0 = arith.constant 0 : i32
    %c0_i32_1 = arith.constant 0 : i32
    return %c0_i32, %c0_i32_0 : i32, i32
  }
  func.func @transform_9(%arg0: i32) -> (i32, i32) {
    %c0_i32 = arith.constant 0 : i32
    %c0_i32_0 = arith.constant 0 : i32
    %c0_i32_1 = arith.constant 0 : i32
    return %c0_i32, %c0_i32_0 : i32, i32
  }
  func.func @transform_10(%arg0: i32) -> (i32, i32) {
    %c0_i32 = arith.constant 0 : i32
    %c0_i32_0 = arith.constant 0 : i32
    %c0_i32_1 = arith.constant 0 : i32
    return %c0_i32, %c0_i32_0 : i32, i32
  }
  func.func @transform_11(%arg0: i32) -> (i32, i32) {
    %c0_i32 = arith.constant 0 : i32
    %c0_i32_0 = arith.constant 0 : i32
    %c0_i32_1 = arith.constant 0 : i32
    return %c0_i32, %c0_i32_0 : i32, i32
  }
}

</mosaic_0001>

<bundles_post_ra>
// kernel: minibatch_egnn_infer.1
= control target key start
LH: loop header
LB: loop body
LE: loop exit
PB: predicated region body
PF: predicated region fallthrough
CT: control target
= control target key end

     0   :  { %v2323_v0 = vmov 0   ;;  %v47_v45 = vlaneseq  ;;  %vm261_vm4 = vcmask 523264   ;;  %v2324_v51 = vmov 0.0   ;;  %s2325_s20 = smov 16   ;;  %s2327_s25 = smov 48   ;;  %s3524_s2 = inlined_call_operand.vmem [shape: s32[256,1], index: 2, kind: input, shape index: {}]   ;;  %s3525_s0 = inlined_call_operand.vmem [shape: f32[64,16], index: 0, kind: input, shape index: {}]   ;;  %s3526_s3 = inlined_call_operand.vmem [shape: bf16[64,32], index: 3, kind: input, shape index: {}]   ;;  %s3527_s1 = inlined_call_operand.vmem [shape: f32[256,64], index: 1, kind: input, shape index: {}]   ;;  %s3528_s6 = inlined_call_operand.vmem [shape: s32[128,1], index: 6, kind: input, shape index: {}]   ;;  %s3529_s4 = inlined_call_operand.vmem [shape: f32[1,32], index: 4, kind: input, shape index: {}]   ;;  %s3530_s7 = inlined_call_operand.vmem [shape: bf16[128,32], index: 7, kind: input, shape index: {}]   ;;  %s3531_s5 = inlined_call_operand.vmem [shape: f32[128,128], index: 5, kind: input, shape index: {}]   ;;  %s3532_s9 = inlined_call_operand.vmem [shape: bf16[32,128], index: 9, kind: input, shape index: {}]   ;;  %s3533_s8 = inlined_call_operand.vmem [shape: f32[1,32], index: 8, kind: input, shape index: {}]   ;;  %s3534_s10 = inlined_call_operand.vmem [shape: f32[1,128], index: 10, kind: input, shape index: {}]   ;;  %s3535_s11 = inlined_call_operand.vmem [shape: f32[16,128], index: 11, kind: output, shape index: {}]  }
   0x1   :  { %2308 = vset.pattern.permute.xlu1 %v2323_v0  ;;  %2307 = vset.pattern.permute.xlu0 %v2323_v0  ;;  %v51_v1 = vld [vmem:[%s3524_s2 + $0x10] sm:$0xff]  ;;  %v49_v2 = vld [vmem:[%s3524_s2] sm:$0xff]  ;;  %v52_v3 = vld [vmem:[%s3524_s2 + $0x18] sm:$0xff]  ;;  %s2329_s13 = smov 96  }
   0x2   :  { %88 = vperm.xlu1 %2308, %v51_v1   ;;  %82 = vperm.xlu0 %2307, %v49_v2   ;;  %v50_v4 = vld [vmem:[%s3524_s2 + $0x8] sm:$0xff]  ;;  %v53_v6 = vld [vmem:[%s3524_s2 + $0x20] sm:$0xff]  ;;  %v56_v7 = vld [vmem:[%s3524_s2 + $0x38] sm:$0xff]  ;;  %v2511_v46 = vand.u32 127, %v47_v45 }
   0x3   :  { %v54_v5 = vld [vmem:[%s3524_s2 + $0x28] sm:$0xff]  ;;  %v55_v8 = vld [vmem:[%s3524_s2 + $0x30] sm:$0xff]  ;;  %v39_v9 = vld [vmem:[%s3525_s0] sm:$0xff] }
   0x4   :  { %v40_v10 = vld [vmem:[%s3525_s0 + $0x8] sm:$0xff]  ;;  %v41_v11 = vld [vmem:[%s3525_s0 + $0x10] sm:$0xff]  ;;  %v42_v12 = vld [vmem:[%s3525_s0 + $0x18] sm:$0xff] }
   0x5   :  { %v257_v13 = vpack.c.bf16 %v40_v10, %v39_v9  ;;  %v258_v14 = vpack.c.bf16 %v42_v12, %v41_v11  ;;  %v43_v15 = vld [vmem:[%s3525_s0 + $0x20] sm:$0xff]  ;;  %v44_v16 = vld [vmem:[%s3525_s0 + $0x28] sm:$0xff]  ;;  %v45_v20 = vld [vmem:[%s3525_s0 + $0x30] sm:$0xff] }
   0x6   :  { %91 = vperm.xlu1 %2308, %v52_v3   ;;  %85 = vperm.xlu0 %2307, %v50_v4   ;;  %v58_v17 = vld [vmem:[%s3524_s2 + $0x48] sm:$0xff]  ;;  %v57_v18 = vld [vmem:[%s3524_s2 + $0x40] sm:$0xff]  ;;  %v259_v19 = vpack.c.bf16 %v44_v16, %v43_v15  ;;  %v46_v21 = vld [vmem:[%s3525_s0 + $0x38] sm:$0xff]  ;;  %s2326_s0 = smov 32  }
   0x7   :  { %2159 = vmatprep.subr.bf16.mxu0 %v257_v13  ;;  %v60_v22 = vld [vmem:[%s3524_s2 + $0x58] sm:$0xff]  ;;  %v59_v23 = vld [vmem:[%s3524_s2 + $0x50] sm:$0xff]  ;;  %v260_v24 = vpack.c.bf16 %v46_v21, %v45_v20  ;;  %v62_v25 = vld [vmem:[%s3524_s2 + $0x68] sm:$0xff] }
   0x8   :  { %2160 = vmatpush3.bf16.msra.mxu0 %v257_v13  ;;  %v61_v26 = vld [vmem:[%s3524_s2 + $0x60] sm:$0xff]  ;;  %v64_v27 = vld [vmem:[%s3524_s2 + $0x78] sm:$0xff]  ;;  %v63_v28 = vld [vmem:[%s3524_s2 + $0x70] sm:$0xff] }
   0x9   :  { %2161 = vmatprep.subr.bf16.mxu0 %v258_v14  ;;  %v66_v29 = vld [vmem:[%s3524_s2 + $0x88] sm:$0xff]  ;;  %v65_v30 = vld [vmem:[%s3524_s2 + $0x80] sm:$0xff]  ;;  %v68_v31 = vld [vmem:[%s3524_s2 + $0x98] sm:$0xff] }
   0xa   :  { %97 = vperm.xlu1 %2308, %v54_v5   ;;  %94 = vperm.xlu0 %2307, %v53_v6   ;;  %v67_v32 = vld [vmem:[%s3524_s2 + $0x90] sm:$0xff]  ;;  %v70_v33 = vld [vmem:[%s3524_s2 + $0xa8] sm:$0xff]  ;;  %v69_v34 = vld [vmem:[%s3524_s2 + $0xa0] sm:$0xff] }
   0xb   :  { %v72_v35 = vld [vmem:[%s3524_s2 + $0xb8] sm:$0xff]  ;;  %v71_v36 = vld [vmem:[%s3524_s2 + $0xb0] sm:$0xff]  ;;  %v74_v37 = vld [vmem:[%s3524_s2 + $0xc8] sm:$0xff] }
   0xc   :  { %2162 = vmatpush3.bf16.msra.mxu0 %v258_v14  ;;  %v73_v38 = vld [vmem:[%s3524_s2 + $0xc0] sm:$0xff]  ;;  %v76_v39 = vld [vmem:[%s3524_s2 + $0xd8] sm:$0xff]  ;;  %v75_v40 = vld [vmem:[%s3524_s2 + $0xd0] sm:$0xff] }
   0xd   :  { %2163 = vmatprep.subr.bf16.mxu0 %v259_v19  ;;  %v78_v41 = vld [vmem:[%s3524_s2 + $0xe8] sm:$0xff]  ;;  %v77_v42 = vld [vmem:[%s3524_s2 + $0xe0] sm:$0xff]  ;;  %v80_v43 = vld [vmem:[%s3524_s2 + $0xf8] sm:$0xff] }
   0xe   :  { %103 = vperm.xlu1 %2308, %v56_v7   ;;  %100 = vperm.xlu0 %2307, %v55_v8   ;;  %v79_v44 = vld [vmem:[%s3524_s2 + $0xf0] sm:$0xff] }
  0x10   :  { %2164 = vmatpush3.bf16.msra.mxu0 %v259_v19 }
  0x11   :  { %2165 = vmatprep.subr.bf16.mxu0 %v260_v24 }
  0x12   :  { %109 = vperm.xlu1 %2308, %v58_v17   ;;  %106 = vperm.xlu0 %2307, %v57_v18  }
  0x14   :  { %2166 = vmatpush3.bf16.msra.mxu0 %v260_v24 }
  0x16   :  { %115 = vperm.xlu1 %2308, %v60_v22   ;;  %112 = vperm.xlu0 %2307, %v59_v23  }
  0x1a   :  { %121 = vperm.xlu1 %2308, %v62_v25   ;;  %118 = vperm.xlu0 %2307, %v61_v26  }
  0x1e   :  { %127 = vperm.xlu1 %2308, %v64_v27   ;;  %124 = vperm.xlu0 %2307, %v63_v28  }
  0x22   :  { %133 = vperm.xlu1 %2308, %v66_v29   ;;  %130 = vperm.xlu0 %2307, %v65_v30  }
  0x26   :  { %139 = vperm.xlu1 %2308, %v68_v31   ;;  %136 = vperm.xlu0 %2307, %v67_v32  }
  0x2a   :  { %145 = vperm.xlu1 %2308, %v70_v33   ;;  %142 = vperm.xlu0 %2307, %v69_v34  }
  0x2e   :  { %151 = vperm.xlu1 %2308, %v72_v35   ;;  %148 = vperm.xlu0 %2307, %v71_v36  }
  0x32   :  { %157 = vperm.xlu1 %2308, %v74_v37   ;;  %154 = vperm.xlu0 %2307, %v73_v38  }
  0x36   :  { %163 = vperm.xlu1 %2308, %v76_v39   ;;  %160 = vperm.xlu0 %2307, %v75_v40  }
  0x3a   :  { %169 = vperm.xlu1 %2308, %v78_v41   ;;  %166 = vperm.xlu0 %2307, %v77_v42  }
  0x3e   :  { %175 = vperm.xlu1 %2308, %v80_v43   ;;  %172 = vperm.xlu0 %2307, %v79_v44  }
  0x81   :  { %v89_v47 = vpop.permute.xlu1 %88  ;;  %v83_v48 = vpop.permute.xlu0 %82 }
  0x82   :  { %vm179_vm0 = vcmp.eq.s32.totalorder %v2511_v46, %v89_v47  ;;  %vm177_vm1 = vcmp.eq.s32.totalorder %v2511_v46, %v83_v48 }
  0x83   :  { %v211_v52 = vsel %vm179_vm0, 1.0, %v2324_v51  ;;  %v209_v54 = vsel %vm177_vm1, 1.0, %v2324_v51 }
  0x85   :  { %v92_v49 = vpop.permute.xlu1 %91  ;;  %v86_v50 = vpop.permute.xlu0 %85 }
  0x86   :  { %vm180_vm2 = vcmp.eq.s32.totalorder %v2511_v46, %v92_v49  ;;  %vm178_vm3 = vcmp.eq.s32.totalorder %v2511_v46, %v86_v50 }
  0x87   :  { %v212_v53 = vsel %vm180_vm2, 1.0, %v2324_v51  ;;  %v210_v55 = vsel %vm178_vm3, 1.0, %v2324_v51 }
  0x88   :  { %v242_v56 = vpack.c.bf16 %v212_v53, %v211_v52  ;;  %v241_v57 = vpack.c.bf16 %v210_v55, %v209_v54 }
  0x89   :  { %v98_v58 = vpop.permute.xlu1 %97  ;;  %v95_v59 = vpop.permute.xlu0 %94 }
  0x8a   :  { %vm182_vm5 = vcmp.eq.s32.totalorder %v2511_v46, %v98_v58  ;;  %vm181_vm6 = vcmp.eq.s32.totalorder %v2511_v46, %v95_v59  ;;  %2167 = vmatprep.mubr.msk.bf16.mxu0 %vm261_vm4, %v241_v57 }
  0x8b   :  { %v214_v60 = vsel %vm182_vm5, 1.0, %v2324_v51  ;;  %v213_v61 = vsel %vm181_vm6, 1.0, %v2324_v51  ;;  %2168 = vmatmul.mubr.msk.bf16.vlgmr.msra.gmra.mrb[0].mxu0 %vm261_vm4, %v242_v56 }
  0x8c   :  { %v243_v62 = vpack.c.bf16 %v214_v60, %v213_v61 }
  0x8d   :  { %v104_v63 = vpop.permute.xlu1 %103  ;;  %v101_v0 = vpop.permute.xlu0 %100 }
  0x8e   :  { %vm184_vm7 = vcmp.eq.s32.totalorder %v2511_v46, %v104_v63  ;;  %vm183_vm8 = vcmp.eq.s32.totalorder %v2511_v46, %v101_v0  ;;  %2171 = vmatprep.mubr.msk.bf16.mxu0 %vm261_vm4, %v243_v62 }
  0x8f   :  { %v216_v1 = vsel %vm184_vm7, 1.0, %v2324_v51  ;;  %v215_v2 = vsel %vm183_vm8, 1.0, %v2324_v51 }
  0x90   :  { %v244_v3 = vpack.c.bf16 %v216_v1, %v215_v2  ;;  %v2309_v2 = vld [vmem:[%s3526_s3] sm:$0xff]  }
  0x91   :  { %v110_v4 = vpop.permute.xlu1 %109  ;;  %v107_v5 = vpop.permute.xlu0 %106  ;;  %2199 = vmatprep.subr.bf16.mxu1 %v2309_v2 }
  0x92   :  { %vm186_vm9 = vcmp.eq.s32.totalorder %v2511_v46, %v110_v4  ;;  %vm185_vm10 = vcmp.eq.s32.totalorder %v2511_v46, %v107_v5  ;;  %2200 = vmatpush3.bf16.msra.mxu1 %v2309_v2 }
  0x93   :  { %v218_v6 = vsel %vm186_vm9, 1.0, %v2324_v51  ;;  %v217_v7 = vsel %vm185_vm10, 1.0, %v2324_v51  ;;  %2172 = vmatmul.mubr.msk.bf16.gmra.mrb[4].mxu0 %vm261_vm4, %v244_v3 }
  0x94   :  { %v245_v8 = vpack.c.bf16 %v218_v6, %v217_v7  ;;  %v2310_v6 = vld [vmem:[%s3526_s3 + $0x8] sm:$0xff]  }
  0x95   :  { %v116_v9 = vpop.permute.xlu1 %115  ;;  %v113_v10 = vpop.permute.xlu0 %112  ;;  %2201 = vmatprep.subr.bf16.mxu1 %v2310_v6 }
  0x96   :  { %vm188_vm11 = vcmp.eq.s32.totalorder %v2511_v46, %v116_v9  ;;  %vm187_vm12 = vcmp.eq.s32.totalorder %v2511_v46, %v113_v10  ;;  %2175 = vmatprep.mubr.msk.bf16.mxu0 %vm261_vm4, %v245_v8  ;;  %2202 = vmatpush3.bf16.msra.mxu1 %v2310_v6  ;;  %v2311_v8 = vld [vmem:[%s3526_s3 + $0x10] sm:$0xff]  }
  0x97   :  { %v220_v11 = vsel %vm188_vm11, 1.0, %v2324_v51  ;;  %v219_v12 = vsel %vm187_vm12, 1.0, %v2324_v51  ;;  %2203 = vmatprep.subr.bf16.mxu1 %v2311_v8 }
  0x98   :  { %v246_v13 = vpack.c.bf16 %v220_v11, %v219_v12  ;;  %v2312_v12 = vld [vmem:[%s3526_s3 + $0x18] sm:$0xff]  }
  0x99   :  { %v122_v14 = vpop.permute.xlu1 %121  ;;  %v119_v15 = vpop.permute.xlu0 %118 }
  0x9a   :  { %vm190_vm13 = vcmp.eq.s32.totalorder %v2511_v46, %v122_v14  ;;  %vm189_vm14 = vcmp.eq.s32.totalorder %v2511_v46, %v119_v15  ;;  %2204 = vmatpush3.bf16.msra.mxu1 %v2311_v8 }
  0x9b   :  { %v222_v16 = vsel %vm190_vm13, 1.0, %v2324_v51  ;;  %v221_v17 = vsel %vm189_vm14, 1.0, %v2324_v51  ;;  %2176 = vmatmul.mubr.msk.bf16.gmra.mrb[8].mxu0 %vm261_vm4, %v246_v13  ;;  %2205 = vmatprep.subr.bf16.mxu1 %v2312_v12 }
  0x9c   :  { %v247_v18 = vpack.c.bf16 %v222_v16, %v221_v17 }
  0x9d   :  { %v128_v19 = vpop.permute.xlu1 %127  ;;  %v125_v20 = vpop.permute.xlu0 %124 }
  0x9e   :  { %vm192_vm15 = vcmp.eq.s32.totalorder %v2511_v46, %v128_v19  ;;  %vm191_vm0 = vcmp.eq.s32.totalorder %v2511_v46, %v125_v20  ;;  %2179 = vmatprep.mubr.msk.bf16.mxu0 %vm261_vm4, %v247_v18  ;;  %2206 = vmatpush3.bf16.msra.mxu1 %v2312_v12 }
  0x9f   :  { %v224_v21 = vsel %vm192_vm15, 1.0, %v2324_v51  ;;  %v223_v22 = vsel %vm191_vm0, 1.0, %v2324_v51 }
  0xa0   :  { %v248_v23 = vpack.c.bf16 %v224_v21, %v223_v22 }
  0xa1   :  { %v134_v24 = vpop.permute.xlu1 %133  ;;  %v131_v25 = vpop.permute.xlu0 %130 }
  0xa2   :  { %vm194_vm1 = vcmp.eq.s32.totalorder %v2511_v46, %v134_v24  ;;  %vm193_vm2 = vcmp.eq.s32.totalorder %v2511_v46, %v131_v25 }
  0xa3   :  { %v226_v26 = vsel %vm194_vm1, 1.0, %v2324_v51  ;;  %v225_v27 = vsel %vm193_vm2, 1.0, %v2324_v51  ;;  %2180 = vmatmul.mubr.msk.bf16.gmra.mrb[12].mxu0 %vm261_vm4, %v248_v23  ;;  %vm791_vm2 = vcmask 130048  }
  0xa4   :  { %v249_v28 = vpack.c.bf16 %v226_v26, %v225_v27 }
  0xa5   :  { %v140_v29 = vpop.permute.xlu1 %139  ;;  %v137_v30 = vpop.permute.xlu0 %136 }
  0xa6   :  { %vm196_vm3 = vcmp.eq.s32.totalorder %v2511_v46, %v140_v29  ;;  %vm195_vm5 = vcmp.eq.s32.totalorder %v2511_v46, %v137_v30  ;;  %2183 = vmatprep.mubr.msk.bf16.mxu0 %vm261_vm4, %v249_v28 }
  0xa7   :  { %v228_v31 = vsel %vm196_vm3, 1.0, %v2324_v51  ;;  %v227_v32 = vsel %vm195_vm5, 1.0, %v2324_v51  ;;  %vm824_vm3 = vcmask 261120   ;;  %vm857_vm5 = vcmask 392192  }
  0xa8   :  { %v250_v33 = vpack.c.bf16 %v228_v31, %v227_v32 }
  0xa9   :  { %v146_v34 = vpop.permute.xlu1 %145  ;;  %v143_v35 = vpop.permute.xlu0 %142 }
  0xaa   :  { %vm198_vm6 = vcmp.eq.s32.totalorder %v2511_v46, %v146_v34  ;;  %vm197_vm7 = vcmp.eq.s32.totalorder %v2511_v46, %v143_v35 }
  0xab   :  { %v230_v36 = vsel %vm198_vm6, 1.0, %v2324_v51  ;;  %v229_v37 = vsel %vm197_vm7, 1.0, %v2324_v51  ;;  %2184 = vmatmul.mubr.msk.bf16.gmra.mrb[16].mxu0 %vm261_vm4, %v250_v33 }
  0xac   :  { %v251_v38 = vpack.c.bf16 %v230_v36, %v229_v37 }
  0xad   :  { %v152_v39 = vpop.permute.xlu1 %151  ;;  %v149_v40 = vpop.permute.xlu0 %148 }
  0xae   :  { %vm200_vm8 = vcmp.eq.s32.totalorder %v2511_v46, %v152_v39  ;;  %vm199_vm9 = vcmp.eq.s32.totalorder %v2511_v46, %v149_v40  ;;  %2187 = vmatprep.mubr.msk.bf16.mxu0 %vm261_vm4, %v251_v38 }
  0xaf   :  { %v232_v41 = vsel %vm200_vm8, 1.0, %v2324_v51  ;;  %v231_v42 = vsel %vm199_vm9, 1.0, %v2324_v51 }
  0xb0   :  { %v252_v43 = vpack.c.bf16 %v232_v41, %v231_v42 }
  0xb1   :  { %v158_v44 = vpop.permute.xlu1 %157  ;;  %v155_v45 = vpop.permute.xlu0 %154 }
  0xb2   :  { %vm202_vm10 = vcmp.eq.s32.totalorder %v2511_v46, %v158_v44  ;;  %vm201_vm11 = vcmp.eq.s32.totalorder %v2511_v46, %v155_v45 }
  0xb3   :  { %v234_v47 = vsel %vm202_vm10, 1.0, %v2324_v51  ;;  %v233_v48 = vsel %vm201_vm11, 1.0, %v2324_v51  ;;  %2188 = vmatmul.mubr.msk.bf16.gmra.mrb[20].mxu0 %vm261_vm4, %v252_v43 }
  0xb4   :  { %v253_v49 = vpack.c.bf16 %v234_v47, %v233_v48  ;;  %v892_v47 = vld [vmem:[%s3527_s1 + $0x10] sm:$0xff] }
  0xb5   :  { %v164_v50 = vpop.permute.xlu1 %163  ;;  %v161_v52 = vpop.permute.xlu0 %160 }
  0xb6   :  { %vm204_vm12 = vcmp.eq.s32.totalorder %v2511_v46, %v164_v50  ;;  %vm203_vm13 = vcmp.eq.s32.totalorder %v2511_v46, %v161_v52  ;;  %2191 = vmatprep.mubr.msk.bf16.mxu0 %vm261_vm4, %v253_v49  ;;  %v893_v49 = vld [vmem:[%s3527_s1 + $0x18] sm:$0xff] }
  0xb7   :  { %v236_v53 = vsel %vm204_vm12, 1.0, %v2324_v51  ;;  %v235_v54 = vsel %vm203_vm13, 1.0, %v2324_v51 }
  0xb8   :  { %v254_v55 = vpack.c.bf16 %v236_v53, %v235_v54 }
  0xb9   :  { %v170_v56 = vpop.permute.xlu1 %169  ;;  %v167_v57 = vpop.permute.xlu0 %166 }
  0xba   :  { %vm206_vm14 = vcmp.eq.s32.totalorder %v2511_v46, %v170_v56  ;;  %vm205_vm15 = vcmp.eq.s32.totalorder %v2511_v46, %v167_v57 }
  0xbb   :  { %v238_v58 = vsel %vm206_vm14, 1.0, %v2324_v51  ;;  %v237_v59 = vsel %vm205_vm15, 1.0, %v2324_v51  ;;  %2192 = vmatmul.mubr.msk.bf16.gmra.mrb[24].mxu0 %vm261_vm4, %v254_v55 }
  0xbc   :  { %v255_v60 = vpack.c.bf16 %v238_v58, %v237_v59 }
  0xbd   :  { %v176_v61 = vpop.permute.xlu1 %175  ;;  %v173_v62 = vpop.permute.xlu0 %172 }
  0xbe   :  { %vm208_vm0 = vcmp.eq.s32.totalorder %v2511_v46, %v176_v61  ;;  %vm207_vm1 = vcmp.eq.s32.totalorder %v2511_v46, %v173_v62  ;;  %2195 = vmatprep.mubr.msk.bf16.mxu0 %vm261_vm4, %v255_v60 }
  0xbf   :  { %v240_v63 = vsel %vm208_vm0, 1.0, %v2324_v51  ;;  %v239_v0 = vsel %vm207_vm1, 1.0, %v2324_v51 }
  0xc0   :  { %v256_v1 = vpack.c.bf16 %v240_v63, %v239_v0 }
  0xc3   :  { %2196 = vmatmul.mubr.msk.bf16.gmra.mrb[28].mxu0 %vm261_vm4, %v256_v1  ;;  %v890_v1 = vld [vmem:[%s3527_s1] sm:$0xff] }
 0x15e   :  { %v2596_v3 = vpop.f32.mrb[0].mxu0 }
 0x15f   :  { %507 = vrot.lane.b32.xlu0 %v2596_v3, %s2325_s20  ;;  %v2600_v4 = vpop.f32.mrb[1].mxu0 }
 0x160   :  { %v2602_v5 = vpop.f32.mrb[2].mxu0 }
 0x161   :  { %509 = vrot.lane.b32.xlu1 %v2602_v5, %s2325_s20  ;;  %v2609_v7 = vpop.f32.mrb[3].mxu0 }
 0x163   :  { %603 = vrot.lane.b32.xlu0 %v2596_v3, %s2326_s0 }
 0x165   :  { %605 = vrot.lane.b32.xlu1 %v2602_v5, %s2326_s0 }
 0x166   :  { %v2618_v9 = vpop.f32.mrb[4].mxu0 }
 0x167   :  { %699 = vrot.lane.b32.xlu0 %v2596_v3, %s2327_s25  ;;  %v2622_v10 = vpop.f32.mrb[5].mxu0 }
 0x168   :  { %v2624_v11 = vpop.f32.mrb[6].mxu0 }
 0x169   :  { %701 = vrot.lane.b32.xlu1 %v2602_v5, %s2327_s25  ;;  %v2631_v13 = vpop.f32.mrb[7].mxu0 }
 0x16b   :  { %503 = vrot.lane.b32.xlu0 %v2600_v4, %s2325_s20 }
 0x16d   :  { %505 = vrot.lane.b32.xlu1 %v2609_v7, %s2325_s20 }
 0x16e   :  { %v2637_v14 = vpop.f32.mrb[8].mxu0 }
 0x16f   :  { %599 = vrot.lane.b32.xlu0 %v2600_v4, %s2326_s0  ;;  %v2641_v15 = vpop.f32.mrb[9].mxu0 }
 0x170   :  { %v2643_v16 = vpop.f32.mrb[10].mxu0 }
 0x171   :  { %601 = vrot.lane.b32.xlu1 %v2609_v7, %s2326_s0  ;;  %v2647_v17 = vpop.f32.mrb[11].mxu0 }
 0x173   :  { %695 = vrot.lane.b32.xlu0 %v2600_v4, %s2327_s25 }
 0x175   :  { %697 = vrot.lane.b32.xlu1 %v2609_v7, %s2327_s25 }
 0x176   :  { %v2653_v18 = vpop.f32.mrb[12].mxu0 }
 0x177   :  { %515 = vrot.lane.b32.xlu0 %v2618_v9, %s2325_s20  ;;  %v2657_v19 = vpop.f32.mrb[13].mxu0 }
 0x178   :  { %v2659_v20 = vpop.f32.mrb[14].mxu0 }
 0x179   :  { %517 = vrot.lane.b32.xlu1 %v2624_v11, %s2325_s20  ;;  %v2663_v21 = vpop.f32.mrb[15].mxu0 }
 0x17b   :  { %611 = vrot.lane.b32.xlu0 %v2618_v9, %s2326_s0 }
 0x17d   :  { %613 = vrot.lane.b32.xlu1 %v2624_v11, %s2326_s0 }
 0x17e   :  { %v2669_v22 = vpop.f32.mrb[16].mxu0 }
 0x17f   :  { %707 = vrot.lane.b32.xlu0 %v2618_v9, %s2327_s25  ;;  %v2673_v23 = vpop.f32.mrb[17].mxu0 }
 0x180   :  { %v2675_v24 = vpop.f32.mrb[18].mxu0 }
 0x181   :  { %709 = vrot.lane.b32.xlu1 %v2624_v11, %s2327_s25  ;;  %v2679_v25 = vpop.f32.mrb[19].mxu0 }
 0x183   :  { %511 = vrot.lane.b32.xlu0 %v2622_v10, %s2325_s20 }
 0x185   :  { %513 = vrot.lane.b32.xlu1 %v2631_v13, %s2325_s20 }
 0x186   :  { %v2685_v26 = vpop.f32.mrb[20].mxu0 }
 0x187   :  { %607 = vrot.lane.b32.xlu0 %v2622_v10, %s2326_s0  ;;  %v2689_v27 = vpop.f32.mrb[21].mxu0 }
 0x188   :  { %v2691_v28 = vpop.f32.mrb[22].mxu0 }
 0x189   :  { %609 = vrot.lane.b32.xlu1 %v2631_v13, %s2326_s0  ;;  %v2695_v29 = vpop.f32.mrb[23].mxu0 }
 0x18b   :  { %703 = vrot.lane.b32.xlu0 %v2622_v10, %s2327_s25 }
 0x18d   :  { %705 = vrot.lane.b32.xlu1 %v2631_v13, %s2327_s25 }
 0x18e   :  { %v2701_v30 = vpop.f32.mrb[24].mxu0 }
 0x18f   :  { %523 = vrot.lane.b32.xlu0 %v2637_v14, %s2325_s20  ;;  %v2705_v31 = vpop.f32.mrb[25].mxu0 }
 0x190   :  { %v2707_v32 = vpop.f32.mrb[26].mxu0 }
 0x191   :  { %525 = vrot.lane.b32.xlu1 %v2643_v16, %s2325_s20  ;;  %v2711_v33 = vpop.f32.mrb[27].mxu0 }
 0x193   :  { %619 = vrot.lane.b32.xlu0 %v2637_v14, %s2326_s0 }
 0x195   :  { %621 = vrot.lane.b32.xlu1 %v2643_v16, %s2326_s0 }
 0x196   :  { %v2717_v34 = vpop.f32.mrb[28].mxu0 }
 0x197   :  { %715 = vrot.lane.b32.xlu0 %v2637_v14, %s2327_s25  ;;  %v2721_v35 = vpop.f32.mrb[29].mxu0 }
 0x198   :  { %v2723_v36 = vpop.f32.mrb[30].mxu0 }
 0x199   :  { %717 = vrot.lane.b32.xlu1 %v2643_v16, %s2327_s25  ;;  %v2727_v37 = vpop.f32.mrb[31].mxu0 }
 0x19b   :  { %519 = vrot.lane.b32.xlu0 %v2641_v15, %s2325_s20 }
 0x19d   :  { %521 = vrot.lane.b32.xlu1 %v2647_v17, %s2325_s20 }
 0x19f   :  { %615 = vrot.lane.b32.xlu0 %v2641_v15, %s2326_s0 }
 0x1a1   :  { %617 = vrot.lane.b32.xlu1 %v2647_v17, %s2326_s0 }
 0x1a3   :  { %711 = vrot.lane.b32.xlu0 %v2641_v15, %s2327_s25 }
 0x1a5   :  { %713 = vrot.lane.b32.xlu1 %v2647_v17, %s2327_s25 }
 0x1a7   :  { %531 = vrot.lane.b32.xlu0 %v2653_v18, %s2325_s20 }
 0x1a9   :  { %533 = vrot.lane.b32.xlu1 %v2659_v20, %s2325_s20 }
 0x1ab   :  { %627 = vrot.lane.b32.xlu0 %v2653_v18, %s2326_s0 }
 0x1ad   :  { %629 = vrot.lane.b32.xlu1 %v2659_v20, %s2326_s0 }
 0x1af   :  { %723 = vrot.lane.b32.xlu0 %v2653_v18, %s2327_s25 }
 0x1b1   :  { %725 = vrot.lane.b32.xlu1 %v2659_v20, %s2327_s25 }
 0x1b3   :  { %527 = vrot.lane.b32.xlu0 %v2657_v19, %s2325_s20 }
 0x1b5   :  { %529 = vrot.lane.b32.xlu1 %v2663_v21, %s2325_s20 }
 0x1b7   :  { %623 = vrot.lane.b32.xlu0 %v2657_v19, %s2326_s0 }
 0x1b9   :  { %625 = vrot.lane.b32.xlu1 %v2663_v21, %s2326_s0 }
 0x1bb   :  { %719 = vrot.lane.b32.xlu0 %v2657_v19, %s2327_s25 }
 0x1bd   :  { %721 = vrot.lane.b32.xlu1 %v2663_v21, %s2327_s25 }
 0x1bf   :  { %539 = vrot.lane.b32.xlu0 %v2669_v22, %s2325_s20 }
 0x1c1   :  { %541 = vrot.lane.b32.xlu1 %v2675_v24, %s2325_s20 }
 0x1c3   :  { %635 = vrot.lane.b32.xlu0 %v2669_v22, %s2326_s0 }
 0x1c5   :  { %637 = vrot.lane.b32.xlu1 %v2675_v24, %s2326_s0 }
 0x1c7   :  { %731 = vrot.lane.b32.xlu0 %v2669_v22, %s2327_s25 }
 0x1c9   :  { %733 = vrot.lane.b32.xlu1 %v2675_v24, %s2327_s25 }
 0x1cb   :  { %535 = vrot.lane.b32.xlu0 %v2673_v23, %s2325_s20 }
 0x1cd   :  { %537 = vrot.lane.b32.xlu1 %v2679_v25, %s2325_s20 }
 0x1cf   :  { %631 = vrot.lane.b32.xlu0 %v2673_v23, %s2326_s0 }
 0x1d1   :  { %v508_v38 = vpop.permute.xlu0 %507  ;;  %633 = vrot.lane.b32.xlu1 %v2679_v25, %s2326_s0 }
 0x1d2   :  { %v794_v42 = vsel %vm791_vm2, %v2596_v3, %v508_v38  ;;  %v891_v3 = vld [vmem:[%s3527_s1 + $0x8] sm:$0xff] }
 0x1d3   :  { %v510_v39 = vpop.permute.xlu1 %509  ;;  %727 = vrot.lane.b32.xlu0 %v2673_v23, %s2327_s25 }
 0x1d4   :  { %v795_v45 = vsel %vm791_vm2, %v2602_v5, %v510_v39 }
 0x1d5   :  { %v604_v40 = vpop.permute.xlu0 %603  ;;  %729 = vrot.lane.b32.xlu1 %v2679_v25, %s2327_s25 }
 0x1d6   :  { %v827_v43 = vsel %vm824_vm3, %v794_v42, %v604_v40 }
 0x1d7   :  { %v606_v41 = vpop.permute.xlu1 %605  ;;  %547 = vrot.lane.b32.xlu0 %v2685_v26, %s2325_s20 }
 0x1d8   :  { %v828_v50 = vsel %vm824_vm3, %v795_v45, %v606_v41 }
 0x1d9   :  { %v700_v44 = vpop.permute.xlu0 %699  ;;  %549 = vrot.lane.b32.xlu1 %v2691_v28, %s2325_s20 }
 0x1da   :  { %v860_v48 = vsel %vm857_vm5, %v827_v43, %v700_v44 }
 0x1db   :  { %v702_v52 = vpop.permute.xlu1 %701  ;;  %643 = vrot.lane.b32.xlu0 %v2685_v26, %s2326_s0  ;;  %v924_v54 = vmul.f32 %v892_v47, %v860_v48  ;;  %v896_v47 = vld [vmem:[%s3527_s1 + $0x30] sm:$0xff] }
 0x1dc   :  { %v861_v53 = vsel %vm857_vm5, %v828_v50, %v702_v52 }
 0x1dd   :  { %v925_v55 = vmul.f32 %v893_v49, %v861_v53  ;;  %v504_v56 = vpop.permute.xlu0 %503  ;;  %645 = vrot.lane.b32.xlu1 %v2691_v28, %s2326_s0  ;;  %v897_v49 = vld [vmem:[%s3527_s1 + $0x38] sm:$0xff] }
 0x1de   :  { %v792_v61 = vsel %vm791_vm2, %v2600_v4, %v504_v56 }
 0x1df   :  { %v955_v57 = vpack.c.bf16 %v925_v55, %v924_v54  ;;  %v506_v58 = vpop.permute.xlu1 %505  ;;  %739 = vrot.lane.b32.xlu0 %v2685_v26, %s2327_s25 }
 0x1e0   :  { %v793_v0 = vsel %vm791_vm2, %v2609_v7, %v506_v58 }
 0x1e1   :  { %v600_v59 = vpop.permute.xlu0 %599  ;;  %741 = vrot.lane.b32.xlu1 %v2691_v28, %s2327_s25 }
 0x1e2   :  { %v825_v62 = vsel %vm824_vm3, %v792_v61, %v600_v59 }
 0x1e3   :  { %v602_v60 = vpop.permute.xlu1 %601  ;;  %543 = vrot.lane.b32.xlu0 %v2689_v27, %s2325_s20 }
 0x1e4   :  { %v826_v4 = vsel %vm824_vm3, %v793_v0, %v602_v60 }
 0x1e5   :  { %v696_v63 = vpop.permute.xlu0 %695  ;;  %545 = vrot.lane.b32.xlu1 %v2695_v29, %s2325_s20 }
 0x1e6   :  { %v858_v2 = vsel %vm857_vm5, %v825_v62, %v696_v63  ;;  %v894_v63 = vld [vmem:[%s3527_s1 + $0x20] sm:$0xff] }
 0x1e7   :  { %v698_v5 = vpop.permute.xlu1 %697  ;;  %639 = vrot.lane.b32.xlu0 %v2689_v27, %s2326_s0  ;;  %v922_v8 = vmul.f32 %v890_v1, %v858_v2  ;;  %v895_v1 = vld [vmem:[%s3527_s1 + $0x28] sm:$0xff] }
 0x1e8   :  { %v859_v6 = vsel %vm857_vm5, %v826_v4, %v698_v5 }
 0x1e9   :  { %v923_v7 = vmul.f32 %v891_v3, %v859_v6  ;;  %v516_v12 = vpop.permute.xlu0 %515  ;;  %641 = vrot.lane.b32.xlu1 %v2695_v29, %s2326_s0 }
 0x1ea   :  { %v798_v42 = vsel %vm791_vm2, %v2618_v9, %v516_v12 }
 0x1eb   :  { %v518_v38 = vpop.permute.xlu1 %517  ;;  %735 = vrot.lane.b32.xlu0 %v2689_v27, %s2327_s25  ;;  %v954_v39 = vpack.c.bf16 %v923_v7, %v922_v8 }
 0x1ec   :  { %v799_v45 = vsel %vm791_vm2, %v2624_v11, %v518_v38 }
 0x1ed   :  { %2207 = vmatprep.mubr.msk.bf16.mxu1 %vm261_vm4, %v954_v39  ;;  %v612_v40 = vpop.permute.xlu0 %611  ;;  %737 = vrot.lane.b32.xlu1 %v2695_v29, %s2327_s25 }
 0x1ee   :  { %2208 = vmatmul.mubr.msk.bf16.vlgmr.msra.gmra.mrb[0].mxu1 %vm261_vm4, %v955_v57  ;;  %v831_v43 = vsel %vm824_vm3, %v798_v42, %v612_v40  ;;  %v900_v42 = vld [vmem:[%s3527_s1 + $0x50] sm:$0xff] }
 0x1ef   :  { %v614_v41 = vpop.permute.xlu1 %613  ;;  %555 = vrot.lane.b32.xlu0 %v2701_v30, %s2325_s20 }
 0x1f0   :  { %v832_v9 = vsel %vm824_vm3, %v799_v45, %v614_v41 }
 0x1f1   :  { %v708_v44 = vpop.permute.xlu0 %707  ;;  %557 = vrot.lane.b32.xlu1 %v2707_v32, %s2325_s20 }
 0x1f2   :  { %v864_v48 = vsel %vm857_vm5, %v831_v43, %v708_v44  ;;  %v901_v44 = vld [vmem:[%s3527_s1 + $0x58] sm:$0xff] }
 0x1f3   :  { %v710_v50 = vpop.permute.xlu1 %709  ;;  %651 = vrot.lane.b32.xlu0 %v2701_v30, %s2326_s0  ;;  %v928_v53 = vmul.f32 %v896_v47, %v864_v48 }
 0x1f4   :  { %v865_v52 = vsel %vm857_vm5, %v832_v9, %v710_v50 }
 0x1f5   :  { %v929_v11 = vmul.f32 %v897_v49, %v865_v52  ;;  %v512_v54 = vpop.permute.xlu0 %511  ;;  %653 = vrot.lane.b32.xlu1 %v2707_v32, %s2326_s0 }
 0x1f6   :  { %v796_v59 = vsel %vm791_vm2, %v2622_v10, %v512_v54 }
 0x1f7   :  { %v957_v55 = vpack.c.bf16 %v929_v11, %v928_v53  ;;  %v514_v56 = vpop.permute.xlu1 %513  ;;  %747 = vrot.lane.b32.xlu0 %v2701_v30, %s2327_s25 }
 0x1f8   :  { %v797_v62 = vsel %vm791_vm2, %v2631_v13, %v514_v56 }
 0x1f9   :  { %v608_v57 = vpop.permute.xlu0 %607  ;;  %749 = vrot.lane.b32.xlu1 %v2707_v32, %s2327_s25 }
 0x1fa   :  { %v829_v60 = vsel %vm824_vm3, %v796_v59, %v608_v57  ;;  %v898_v57 = vld [vmem:[%s3527_s1 + $0x40] sm:$0xff]  ;;  %v899_v59 = vld [vmem:[%s3527_s1 + $0x48] sm:$0xff] }
 0x1fb   :  { %v610_v58 = vpop.permute.xlu1 %609  ;;  %551 = vrot.lane.b32.xlu0 %v2705_v31, %s2325_s20 }
 0x1fc   :  { %v830_v10 = vsel %vm824_vm3, %v797_v62, %v610_v58 }
 0x1fd   :  { %v704_v61 = vpop.permute.xlu0 %703  ;;  %553 = vrot.lane.b32.xlu1 %v2711_v33, %s2325_s20 }
 0x1fe   :  { %v862_v0 = vsel %vm857_vm5, %v829_v60, %v704_v61 }
 0x1ff   :  { %v706_v2 = vpop.permute.xlu1 %705  ;;  %647 = vrot.lane.b32.xlu0 %v2705_v31, %s2326_s0  ;;  %v926_v4 = vmul.f32 %v894_v63, %v862_v0 }
 0x200   :  { %v863_v3 = vsel %vm857_vm5, %v830_v10, %v706_v2  ;;  %v1282_v10 = vld [vmem:[%s3528_s6] sm:$0xff] }
 0x201   :  { %v927_v13 = vmul.f32 %v895_v1, %v863_v3  ;;  %v524_v5 = vpop.permute.xlu0 %523  ;;  %649 = vrot.lane.b32.xlu1 %v2711_v33, %s2326_s0  ;;  %v1283_v3 = vld [vmem:[%s3528_s6 + $0x8] sm:$0xff] }
 0x202   :  { %v802_v38 = vsel %vm791_vm2, %v2637_v14, %v524_v5  ;;  %v1284_v5 = vld [vmem:[%s3528_s6 + $0x10] sm:$0xff] }
 0x203   :  { %v956_v6 = vpack.c.bf16 %v927_v13, %v926_v4  ;;  %v526_v8 = vpop.permute.xlu1 %525  ;;  %743 = vrot.lane.b32.xlu0 %v2705_v31, %s2327_s25 }
 0x204   :  { %v803_v41 = vsel %vm791_vm2, %v2643_v16, %v526_v8 }
 0x205   :  { %2211 = vmatprep.mubr.msk.bf16.mxu1 %vm261_vm4, %v956_v6  ;;  %v620_v7 = vpop.permute.xlu0 %619  ;;  %745 = vrot.lane.b32.xlu1 %v2711_v33, %s2327_s25 }
 0x206   :  { %2212 = vmatmul.mubr.msk.bf16.gmra.mrb[4].mxu1 %vm261_vm4, %v957_v55  ;;  %v835_v39 = vsel %vm824_vm3, %v802_v38, %v620_v7 }
 0x207   :  { %v622_v12 = vpop.permute.xlu1 %621  ;;  %563 = vrot.lane.b32.xlu0 %v2717_v34, %s2325_s20 }
 0x208   :  { %v836_v14 = vsel %vm824_vm3, %v803_v41, %v622_v12  ;;  %v904_v12 = vld [vmem:[%s3527_s1 + $0x70] sm:$0xff] }
 0x209   :  { %v716_v40 = vpop.permute.xlu0 %715  ;;  %565 = vrot.lane.b32.xlu1 %v2723_v36, %s2325_s20 }
 0x20a   :  { %v868_v43 = vsel %vm857_vm5, %v835_v39, %v716_v40  ;;  %v1285_v39 = vld [vmem:[%s3528_s6 + $0x18] sm:$0xff] }
 0x20b   :  { %v718_v45 = vpop.permute.xlu1 %717  ;;  %659 = vrot.lane.b32.xlu0 %v2717_v34, %s2326_s0  ;;  %v932_v48 = vmul.f32 %v900_v42, %v868_v43  ;;  %v1286_v42 = vld [vmem:[%s3528_s6 + $0x20] sm:$0xff] }
 0x20c   :  { %v869_v47 = vsel %vm857_vm5, %v836_v14, %v718_v45  ;;  %v1287_v45 = vld [vmem:[%s3528_s6 + $0x28] sm:$0xff] }
 0x20d   :  { %v933_v16 = vmul.f32 %v901_v44, %v869_v47  ;;  %v520_v49 = vpop.permute.xlu0 %519  ;;  %661 = vrot.lane.b32.xlu1 %v2723_v36, %s2326_s0 }
 0x20e   :  { %v800_v11 = vsel %vm791_vm2, %v2641_v15, %v520_v49 }
 0x20f   :  { %v959_v9 = vpack.c.bf16 %v933_v16, %v932_v48  ;;  %v522_v50 = vpop.permute.xlu1 %521  ;;  %559 = vrot.lane.b32.xlu0 %v2721_v35, %s2325_s20  ;;  %v1288_v16 = vld [vmem:[%s3528_s6 + $0x30] sm:$0xff] }
 0x210   :  { %v801_v56 = vsel %vm791_vm2, %v2647_v17, %v522_v50 }
 0x211   :  { %v616_v52 = vpop.permute.xlu0 %615  ;;  %561 = vrot.lane.b32.xlu1 %v2727_v37, %s2325_s20  ;;  %s2328_s20 = smov 64  }
 0x212   :  { %v833_v54 = vsel %vm824_vm3, %v800_v11, %v616_v52 }
 0x213   :  { %v618_v53 = vpop.permute.xlu1 %617  ;;  %655 = vrot.lane.b32.xlu0 %v2721_v35, %s2326_s0 }
 0x214   :  { %v834_v15 = vsel %vm824_vm3, %v801_v56, %v618_v53  ;;  %v1290_v53 = vld [vmem:[%s3528_s6 + $0x40] sm:$0xff] }
 0x215   :  { %v712_v55 = vpop.permute.xlu0 %711  ;;  %657 = vrot.lane.b32.xlu1 %v2727_v37, %s2326_s0  ;;  %v902_v56 = vld [vmem:[%s3527_s1 + $0x60] sm:$0xff] }
 0x216   :  { %v866_v58 = vsel %vm857_vm5, %v833_v54, %v712_v55 }
 0x217   :  { %v714_v60 = vpop.permute.xlu1 %713  ;;  %751 = vrot.lane.b32.xlu0 %v2721_v35, %s2327_s25  ;;  %v930_v62 = vmul.f32 %v898_v57, %v866_v58  ;;  %v1291_v58 = vld [vmem:[%s3528_s6 + $0x48] sm:$0xff] }
 0x218   :  { %v867_v61 = vsel %vm857_vm5, %v834_v15, %v714_v60  ;;  %v1292_v60 = vld [vmem:[%s3528_s6 + $0x50] sm:$0xff] }
 0x219   :  { %v931_v17 = vmul.f32 %v899_v59, %v867_v61  ;;  %v532_v63 = vpop.permute.xlu0 %531  ;;  %753 = vrot.lane.b32.xlu1 %v2727_v37, %s2327_s25 }
 0x21a   :  { %v806_v13 = vsel %vm791_vm2, %v2653_v18, %v532_v63  ;;  %v905_v18 = vld [vmem:[%s3527_s1 + $0x78] sm:$0xff] }
 0x21b   :  { %v958_v0 = vpack.c.bf16 %v931_v17, %v930_v62  ;;  %v534_v1 = vpop.permute.xlu1 %533  ;;  %755 = vrot.lane.b32.xlu0 %v2717_v34, %s2327_s25  ;;  %v1293_v63 = vld [vmem:[%s3528_s6 + $0x58] sm:$0xff] }
 0x21c   :  { %v807_v7 = vsel %vm791_vm2, %v2659_v20, %v534_v1 }
 0x21d   :  { %2215 = vmatprep.mubr.msk.bf16.mxu1 %vm261_vm4, %v958_v0  ;;  %v628_v2 = vpop.permute.xlu0 %627  ;;  %757 = vrot.lane.b32.xlu1 %v2723_v36, %s2327_s25 }
 0x21e   :  { %2216 = vmatmul.mubr.msk.bf16.gmra.mrb[8].mxu1 %vm261_vm4, %v959_v9  ;;  %v839_v6 = vsel %vm824_vm3, %v806_v13, %v628_v2  ;;  %v1289_v9 = vld [vmem:[%s3528_s6 + $0x38] sm:$0xff] }
 0x21f   :  { %v630_v4 = vpop.permute.xlu1 %629  ;;  %1299 = vperm.xlu0 %2307, %v1282_v10   ;;  %v1294_v10 = vld [vmem:[%s3528_s6 + $0x60] sm:$0xff] }
 0x220   :  { %v840_v40 = vsel %vm824_vm3, %v807_v7, %v630_v4 }
 0x221   :  { %v724_v8 = vpop.permute.xlu0 %723  ;;  %1302 = vperm.xlu1 %2308, %v1283_v3   ;;  %v1295_v3 = vld [vmem:[%s3528_s6 + $0x68] sm:$0xff] }
 0x222   :  { %v872_v38 = vsel %vm857_vm5, %v839_v6, %v724_v8 }
 0x223   :  { %v726_v41 = vpop.permute.xlu1 %725  ;;  %1305 = vperm.xlu0 %2307, %v1284_v5   ;;  %v936_v43 = vmul.f32 %v904_v12, %v872_v38  ;;  %v1296_v5 = vld [vmem:[%s3528_s6 + $0x70] sm:$0xff] }
 0x224   :  { %v873_v20 = vsel %vm857_vm5, %v840_v40, %v726_v41  ;;  %v908_v12 = vld [vmem:[%s3527_s1 + $0x90] sm:$0xff] }
 0x225   :  { %v937_v44 = vmul.f32 %v905_v18, %v873_v20  ;;  %v528_v14 = vpop.permute.xlu0 %527  ;;  %1308 = vperm.xlu1 %2308, %v1285_v39   ;;  %v1297_v18 = vld [vmem:[%s3528_s6 + $0x78] sm:$0xff] }
 0x226   :  { %v804_v52 = vsel %vm791_vm2, %v2657_v19, %v528_v14  ;;  %v903_v19 = vld [vmem:[%s3527_s1 + $0x68] sm:$0xff] }
 0x227   :  { %v961_v47 = vpack.c.bf16 %v937_v44, %v936_v43  ;;  %v530_v48 = vpop.permute.xlu1 %529  ;;  %1311 = vperm.xlu0 %2307, %v1286_v42  }
 0x228   :  { %v805_v55 = vsel %vm791_vm2, %v2663_v21, %v530_v48 }
 0x229   :  { %v624_v49 = vpop.permute.xlu0 %623  ;;  %1314 = vperm.xlu1 %2308, %v1287_v45  }
 0x22a   :  { %v837_v11 = vsel %vm824_vm3, %v804_v52, %v624_v49  ;;  %v907_v52 = vld [vmem:[%s3527_s1 + $0x88] sm:$0xff] }
 0x22b   :  { %v626_v50 = vpop.permute.xlu1 %625  ;;  %1317 = vperm.xlu0 %2307, %v1288_v16  }
 0x22c   :  { %v838_v59 = vsel %vm824_vm3, %v805_v55, %v626_v50 }
 0x22d   :  { %v720_v54 = vpop.permute.xlu0 %719  ;;  %1320 = vperm.xlu1 %2308, %v1289_v9   ;;  %v906_v9 = vld [vmem:[%s3527_s1 + $0x80] sm:$0xff] }
 0x22e   :  { %v870_v57 = vsel %vm857_vm5, %v837_v11, %v720_v54 }
 0x22f   :  { %v722_v15 = vpop.permute.xlu1 %721  ;;  %1323 = vperm.xlu0 %2307, %v1290_v53   ;;  %v934_v61 = vmul.f32 %v902_v56, %v870_v57 }
 0x230   :  { %v871_v21 = vsel %vm857_vm5, %v838_v59, %v722_v15 }
 0x231   :  { %v935_v62 = vmul.f32 %v903_v19, %v871_v21  ;;  %v540_v17 = vpop.permute.xlu0 %539  ;;  %1326 = vperm.xlu1 %2308, %v1291_v58  }
 0x232   :  { %v810_v13 = vsel %vm791_vm2, %v2669_v22, %v540_v17  ;;  %v909_v22 = vld [vmem:[%s3527_s1 + $0x98] sm:$0xff] }
 0x233   :  { %v960_v0 = vpack.c.bf16 %v935_v62, %v934_v61  ;;  %v542_v1 = vpop.permute.xlu1 %541  ;;  %1329 = vperm.xlu0 %2307, %v1292_v60   ;;  %v912_v61 = vld [vmem:[%s3527_s1 + $0xb0] sm:$0xff]  ;;  %v913_v17 = vld [vmem:[%s3527_s1 + $0xb8] sm:$0xff] }
 0x234   :  { %v811_v7 = vsel %vm791_vm2, %v2675_v24, %v542_v1 }
 0x235   :  { %2219 = vmatprep.mubr.msk.bf16.mxu1 %vm261_vm4, %v960_v0  ;;  %v636_v2 = vpop.permute.xlu0 %635  ;;  %1332 = vperm.xlu1 %2308, %v1293_v63  }
 0x236   :  { %2220 = vmatmul.mubr.msk.bf16.gmra.mrb[12].mxu1 %vm261_vm4, %v961_v47  ;;  %v843_v6 = vsel %vm824_vm3, %v810_v13, %v636_v2 }
 0x237   :  { %v638_v4 = vpop.permute.xlu1 %637  ;;  %1335 = vperm.xlu0 %2307, %v1294_v10  }
 0x238   :  { %v844_v39 = vsel %vm824_vm3, %v811_v7, %v638_v4 }
 0x239   :  { %v732_v8 = vpop.permute.xlu0 %731  ;;  %1338 = vperm.xlu1 %2308, %v1295_v3  }
 0x23a   :  { %v876_v38 = vsel %vm857_vm5, %v843_v6, %v732_v8 }
 0x23b   :  { %v734_v40 = vpop.permute.xlu1 %733  ;;  %1341 = vperm.xlu0 %2307, %v1296_v5   ;;  %v940_v41 = vmul.f32 %v908_v12, %v876_v38  ;;  %v910_v12 = vld [vmem:[%s3527_s1 + $0xa0] sm:$0xff] }
 0x23c   :  { %v877_v24 = vsel %vm857_vm5, %v844_v39, %v734_v40 }
 0x23d   :  { %v941_v20 = vmul.f32 %v909_v22, %v877_v24  ;;  %v536_v42 = vpop.permute.xlu0 %535  ;;  %1344 = vperm.xlu1 %2308, %v1297_v18   ;;  %v911_v22 = vld [vmem:[%s3527_s1 + $0xa8] sm:$0xff] }
 0x23e   :  { %v808_v47 = vsel %vm791_vm2, %v2673_v23, %v536_v42 }
 0x23f   :  { %v963_v43 = vpack.c.bf16 %v941_v20, %v940_v41  ;;  %v538_v44 = vpop.permute.xlu1 %537 }
 0x240   :  { %v809_v49 = vsel %vm791_vm2, %v2679_v25, %v538_v44 }
 0x241   :  { %v632_v14 = vpop.permute.xlu0 %631 }
 0x242   :  { %v841_v48 = vsel %vm824_vm3, %v808_v47, %v632_v14 }
 0x243   :  { %v634_v45 = vpop.permute.xlu1 %633 }
 0x244   :  { %v842_v53 = vsel %vm824_vm3, %v809_v49, %v634_v45  ;;  %v917_v49 = vld [vmem:[%s3527_s1 + $0xd8] sm:$0xff] }
 0x245   :  { %v728_v16 = vpop.permute.xlu0 %727 }
 0x246   :  { %v874_v50 = vsel %vm857_vm5, %v841_v48, %v728_v16  ;;  %v916_v48 = vld [vmem:[%s3527_s1 + $0xd0] sm:$0xff] }
 0x247   :  { %v730_v11 = vpop.permute.xlu1 %729  ;;  %v938_v54 = vmul.f32 %v906_v9, %v874_v50 }
 0x248   :  { %v875_v23 = vsel %vm857_vm5, %v842_v53, %v730_v11 }
 0x249   :  { %v939_v55 = vmul.f32 %v907_v52, %v875_v23  ;;  %v548_v56 = vpop.permute.xlu0 %547 }
 0x24a   :  { %v814_v59 = vsel %vm791_vm2, %v2685_v26, %v548_v56 }
 0x24b   :  { %v962_v57 = vpack.c.bf16 %v939_v55, %v938_v54  ;;  %v550_v25 = vpop.permute.xlu1 %549 }
 0x24c   :  { %v815_v60 = vsel %vm791_vm2, %v2691_v28, %v550_v25 }
 0x24d   :  { %2223 = vmatprep.mubr.msk.bf16.mxu1 %vm261_vm4, %v962_v57  ;;  %v644_v19 = vpop.permute.xlu0 %643 }
 0x24e   :  { %2224 = vmatmul.mubr.msk.bf16.gmra.mrb[16].mxu1 %vm261_vm4, %v963_v43  ;;  %v847_v15 = vsel %vm824_vm3, %v814_v59, %v644_v19 }
 0x24f   :  { %v646_v58 = vpop.permute.xlu1 %645 }
 0x250   :  { %v848_v63 = vsel %vm824_vm3, %v815_v60, %v646_v58  ;;  %v914_v58 = vld [vmem:[%s3527_s1 + $0xc0] sm:$0xff] }
 0x251   :  { %v740_v21 = vpop.permute.xlu0 %739 }
 0x252   :  { %v880_v62 = vsel %vm857_vm5, %v847_v15, %v740_v21  ;;  %v915_v15 = vld [vmem:[%s3527_s1 + $0xc8] sm:$0xff] }
 0x253   :  { %v742_v0 = vpop.permute.xlu1 %741  ;;  %v944_v1 = vmul.f32 %v912_v61, %v880_v62 }
 0x254   :  { %v881_v26 = vsel %vm857_vm5, %v848_v63, %v742_v0 }
 0x255   :  { %v945_v10 = vmul.f32 %v913_v17, %v881_v26  ;;  %v544_v2 = vpop.permute.xlu0 %543 }
 0x256   :  { %v812_v5 = vsel %vm791_vm2, %v2689_v27, %v544_v2 }
 0x257   :  { %v965_v3 = vpack.c.bf16 %v945_v10, %v944_v1  ;;  %v546_v28 = vpop.permute.xlu1 %545 }
 0x258   :  { %v813_v7 = vsel %vm791_vm2, %v2695_v29, %v546_v28 }
 0x259   :  { %v640_v4 = vpop.permute.xlu0 %639 }
 0x25a   :  { %v845_v6 = vsel %vm824_vm3, %v812_v5, %v640_v4 }
 0x25b   :  { %v642_v13 = vpop.permute.xlu1 %641 }
 0x25c   :  { %v846_v18 = vsel %vm824_vm3, %v813_v7, %v642_v13  ;;  %v919_v7 = vld [vmem:[%s3527_s1 + $0xe8] sm:$0xff] }
 0x25d   :  { %v736_v8 = vpop.permute.xlu0 %735 }
 0x25e   :  { %v878_v38 = vsel %vm857_vm5, %v845_v6, %v736_v8  ;;  %v918_v6 = vld [vmem:[%s3527_s1 + $0xe0] sm:$0xff] }
 0x25f   :  { %v738_v39 = vpop.permute.xlu1 %737  ;;  %v942_v40 = vmul.f32 %v910_v12, %v878_v38 }
 0x260   :  { %v879_v27 = vsel %vm857_vm5, %v846_v18, %v738_v39 }
 0x261   :  { %v943_v24 = vmul.f32 %v911_v22, %v879_v27  ;;  %v556_v41 = vpop.permute.xlu0 %555 }
 0x262   :  { %v818_v44 = vsel %vm791_vm2, %v2701_v30, %v556_v41 }
 0x263   :  { %v964_v20 = vpack.c.bf16 %v943_v24, %v942_v40  ;;  %v558_v29 = vpop.permute.xlu1 %557  ;;  %v920_v24 = vld [vmem:[%s3527_s1 + $0xf0] sm:$0xff] }
 0x264   :  { %v819_v47 = vsel %vm791_vm2, %v2707_v32, %v558_v29 }
 0x265   :  { %2227 = vmatprep.mubr.msk.bf16.mxu1 %vm261_vm4, %v964_v20  ;;  %v652_v42 = vpop.permute.xlu0 %651 }
 0x266   :  { %2228 = vmatmul.mubr.msk.bf16.gmra.mrb[20].mxu1 %vm261_vm4, %v965_v3  ;;  %v851_v14 = vsel %vm824_vm3, %v818_v44, %v652_v42 }
 0x267   :  { %v654_v43 = vpop.permute.xlu1 %653 }
 0x268   :  { %v852_v9 = vsel %vm824_vm3, %v819_v47, %v654_v43 }
 0x269   :  { %v748_v45 = vpop.permute.xlu0 %747 }
 0x26a   :  { %v884_v16 = vsel %vm857_vm5, %v851_v14, %v748_v45 }
 0x26b   :  { %v750_v50 = vpop.permute.xlu1 %749  ;;  %v948_v52 = vmul.f32 %v916_v48, %v884_v16 }
 0x26c   :  { %v885_v30 = vsel %vm857_vm5, %v852_v9, %v750_v50 }
 0x26d   :  { %v949_v53 = vmul.f32 %v917_v49, %v885_v30  ;;  %v552_v11 = vpop.permute.xlu0 %551 }
 0x26e   :  { %v816_v56 = vsel %vm791_vm2, %v2705_v31, %v552_v11 }
 0x26f   :  { %v967_v23 = vpack.c.bf16 %v949_v53, %v948_v52  ;;  %v554_v32 = vpop.permute.xlu1 %553  ;;  %v3157_v53 = vld [vmem:[%s3529_s4] ss:$0 sm:$0xff] }
 0x270   :  { %v817_v19 = vsel %vm791_vm2, %v2711_v33, %v554_v32 }
 0x271   :  { %v648_v54 = vpop.permute.xlu0 %647 }
 0x272   :  { %v849_v57 = vsel %vm824_vm3, %v816_v56, %v648_v54 }
 0x273   :  { %v650_v55 = vpop.permute.xlu1 %649 }
 0x274   :  { %v850_v21 = vsel %vm824_vm3, %v817_v19, %v650_v55 }
 0x275   :  { %v744_v25 = vpop.permute.xlu0 %743 }
 0x276   :  { %v882_v59 = vsel %vm857_vm5, %v849_v57, %v744_v25 }
 0x277   :  { %v746_v60 = vpop.permute.xlu1 %745  ;;  %v946_v61 = vmul.f32 %v914_v58, %v882_v59 }
 0x278   :  { %v883_v31 = vsel %vm857_vm5, %v850_v21, %v746_v60 }
 0x279   :  { %v947_v62 = vmul.f32 %v915_v15, %v883_v31  ;;  %v564_v17 = vpop.permute.xlu0 %563 }
 0x27b   :  { %v966_v63 = vpack.c.bf16 %v947_v62, %v946_v61  ;;  %v566_v33 = vpop.permute.xlu1 %565 }
 0x27c   :  { %v823_v40 = vsel %vm791_vm2, %v2723_v36, %v566_v33 }
 0x27d   :  { %2231 = vmatprep.mubr.msk.bf16.mxu1 %vm261_vm4, %v966_v63  ;;  %v660_v0 = vpop.permute.xlu0 %659 }
 0x27e   :  { %2232 = vmatmul.mubr.msk.bf16.gmra.mrb[24].mxu1 %vm261_vm4, %v967_v23 }
 0x27f   :  { %v662_v26 = vpop.permute.xlu1 %661 }
 0x280   :  { %v856_v20 = vsel %vm824_vm3, %v823_v40, %v662_v26 }
 0x281   :  { %v560_v1 = vpop.permute.xlu0 %559 }
 0x282   :  { %v820_v28 = vsel %vm791_vm2, %v2721_v35, %v560_v1  ;;  %v822_v35 = vsel %vm791_vm2, %v2717_v34, %v564_v17  ;;  %v921_v34 = vld [vmem:[%s3527_s1 + $0xf8] sm:$0xff] }
 0x283   :  { %v562_v10 = vpop.permute.xlu1 %561 }
 0x284   :  { %v821_v5 = vsel %vm791_vm2, %v2727_v37, %v562_v10  ;;  %v855_v37 = vsel %vm824_vm3, %v822_v35, %v660_v0 }
 0x285   :  { %v656_v2 = vpop.permute.xlu0 %655 }
 0x286   :  { %v853_v4 = vsel %vm824_vm3, %v820_v28, %v656_v2 }
 0x287   :  { %v658_v3 = vpop.permute.xlu1 %657 }
 0x288   :  { %v854_v12 = vsel %vm824_vm3, %v821_v5, %v658_v3 }
 0x289   :  { %v752_v13 = vpop.permute.xlu0 %751 }
 0x28a   :  { %v886_v8 = vsel %vm857_vm5, %v853_v4, %v752_v13 }
 0x28b   :  { %v754_v38 = vpop.permute.xlu1 %753  ;;  %v950_v18 = vmul.f32 %v918_v6, %v886_v8 }
 0x28c   :  { %v887_v22 = vsel %vm857_vm5, %v854_v12, %v754_v38 }
 0x28d   :  { %v951_v39 = vmul.f32 %v919_v7, %v887_v22  ;;  %v756_v27 = vpop.permute.xlu0 %755 }
 0x28e   :  { %v888_v41 = vsel %vm857_vm5, %v855_v37, %v756_v27 }
 0x28f   :  { %v968_v29 = vpack.c.bf16 %v951_v39, %v950_v18  ;;  %v758_v42 = vpop.permute.xlu1 %757  ;;  %v952_v44 = vmul.f32 %v920_v24, %v888_v41 }
 0x290   :  { %v889_v43 = vsel %vm857_vm5, %v856_v20, %v758_v42 }
 0x291   :  { %v953_v14 = vmul.f32 %v921_v34, %v889_v43  ;;  %2235 = vmatprep.mubr.msk.bf16.mxu1 %vm261_vm4, %v968_v29 }
 0x293   :  { %v969_v36 = vpack.c.bf16 %v953_v14, %v952_v44 }
 0x295   :  { %2236 = vmatmul.mubr.msk.bf16.gmra.mrb[28].mxu1 %vm261_vm4, %v969_v36 }
 0x29e   :  { %v1300_v45 = vpop.permute.xlu0 %1299 }
 0x29f   :  { %vm1346_vm6 = vcmp.eq.s32.totalorder %v2511_v46, %v1300_v45 }
 0x2a0   :  { %v1303_v47 = vpop.permute.xlu1 %1302  ;;  %v1362_v48 = vsel %vm1346_vm6, 1.0, %v2324_v51 }
 0x2a1   :  { %vm1347_vm7 = vcmp.eq.s32.totalorder %v2511_v46, %v1303_v47 }
 0x2a2   :  { %v1363_v16 = vsel %vm1347_vm7, 1.0, %v2324_v51 }
 0x2a3   :  { %v1378_v49 = vpack.c.bf16 %v1363_v16, %v1362_v48 }
 0x2a5   :  { %2243 = vmatprep.mubr.msk.bf16.mxu0 %vm824_vm3, %v1378_v49 }
 0x2c1   :  { %v2209_v9 = vpop.f32.mrb[0].mxu1 }
 0x2c2   :  { %v1091_v50 = vpop.f32.mrb[1].mxu1  ;;  %v1100_v11 = vadd.f32 %v2209_v9, %v3157_v53 }
 0x2c3   :  { %v2210_v30 = vpop.f32.mrb[2].mxu1  ;;  %v1092_v23 = vadd.f32 %v3157_v53, %v1091_v50 }
 0x2c4   :  { %v1094_v52 = vpop.f32.mrb[3].mxu1  ;;  %v1103_v54 = vadd.f32 %v2210_v30, %v3157_v53  ;;  %v1220_v58 = vmax.f32 %v1100_v11, 0.0 }
 0x2c5   :  { %v1095_v57 = vadd.f32 %v3157_v53, %v1094_v52  ;;  %v1218_v60 = vmax.f32 %v1092_v23, 0.0 }
 0x2c6   :  { %v1221_v62 = vmax.f32 %v1103_v54, 0.0 }
 0x2c7   :  { %v1219_v33 = vmax.f32 %v1095_v57, 0.0 }
 0x2d9   :  { %v2213_v32 = vpop.f32.mrb[4].mxu1 }
 0x2da   :  { %v1116_v55 = vadd.f32 %v2213_v32, %v3157_v53  ;;  %v1107_v56 = vpop.f32.mrb[5].mxu1 }
 0x2db   :  { %v1108_v25 = vadd.f32 %v3157_v53, %v1107_v56  ;;  %v2214_v19 = vpop.f32.mrb[6].mxu1 }
 0x2dc   :  { %v1224_v59 = vmax.f32 %v1116_v55, 0.0  ;;  %v1119_v15 = vadd.f32 %v2214_v19, %v3157_v53  ;;  %v1110_v21 = vpop.f32.mrb[7].mxu1 }
 0x2dd   :  { %v1222_v31 = vmax.f32 %v1108_v25, 0.0  ;;  %v1111_v61 = vadd.f32 %v3157_v53, %v1110_v21 }
 0x2de   :  { %v1252_v17 = vadd.f32 %v1224_v59, %v1220_v58  ;;  %v1225_v63 = vmax.f32 %v1119_v15, 0.0 }
 0x2df   :  { %v1250_v0 = vadd.f32 %v1222_v31, %v1218_v60  ;;  %v1223_v26 = vmax.f32 %v1111_v61, 0.0 }
 0x2e0   :  { %v1253_v1 = vadd.f32 %v1225_v63, %v1221_v62 }
 0x2e1   :  { %v1251_v10 = vadd.f32 %v1223_v26, %v1219_v33 }
 0x2f1   :  { %v2217_v2 = vpop.f32.mrb[8].mxu1 }
 0x2f2   :  { %v1123_v3 = vpop.f32.mrb[9].mxu1  ;;  %v1132_v13 = vadd.f32 %v2217_v2, %v3157_v53 }
 0x2f3   :  { %v2218_v28 = vpop.f32.mrb[10].mxu1  ;;  %v1124_v5 = vadd.f32 %v3157_v53, %v1123_v3 }
 0x2f4   :  { %v1126_v4 = vpop.f32.mrb[11].mxu1  ;;  %v1135_v8 = vadd.f32 %v2218_v28, %v3157_v53  ;;  %v1228_v37 = vmax.f32 %v1132_v13, 0.0 }
 0x2f5   :  { %v1127_v38 = vadd.f32 %v3157_v53, %v1126_v4  ;;  %v1226_v40 = vmax.f32 %v1124_v5, 0.0 }
 0x2f6   :  { %v1229_v34 = vmax.f32 %v1135_v8, 0.0 }
 0x2f7   :  { %v1227_v42 = vmax.f32 %v1127_v38, 0.0 }
 0x309   :  { %v2221_v6 = vpop.f32.mrb[12].mxu1 }
 0x30a   :  { %v1148_v7 = vadd.f32 %v2221_v6, %v3157_v53  ;;  %v1139_v12 = vpop.f32.mrb[13].mxu1 }
 0x30b   :  { %v1140_v35 = vadd.f32 %v3157_v53, %v1139_v12  ;;  %v2222_v22 = vpop.f32.mrb[14].mxu1  ;;  %v1309_v12 = vpop.permute.xlu1 %1308 }
 0x30c   :  { %v1232_v18 = vmax.f32 %v1148_v7, 0.0  ;;  %v1151_v39 = vadd.f32 %v2222_v22, %v3157_v53  ;;  %v1142_v27 = vpop.f32.mrb[15].mxu1  ;;  %vm1349_vm8 = vcmp.eq.s32.totalorder %v2511_v46, %v1309_v12 }
 0x30d   :  { %v1230_v24 = vmax.f32 %v1140_v35, 0.0  ;;  %v1143_v41 = vadd.f32 %v3157_v53, %v1142_v27 }
 0x30e   :  { %v1256_v20 = vadd.f32 %v1232_v18, %v1228_v37  ;;  %v1233_v29 = vmax.f32 %v1151_v39, 0.0 }
 0x30f   :  { %v1254_v43 = vadd.f32 %v1230_v24, %v1226_v40  ;;  %v1231_v44 = vmax.f32 %v1143_v41, 0.0  ;;  %v1306_v40 = vpop.permute.xlu0 %1305 }
 0x310   :  { %v3175_v14 = vadd.f32 %v1256_v20, %v1252_v17  ;;  %v1257_v36 = vadd.f32 %v1233_v29, %v1229_v34  ;;  %vm1348_vm10 = vcmp.eq.s32.totalorder %v2511_v46, %v1306_v40  ;;  %v2317_v40 = vld [vmem:[%s3530_s7 + $0x20] sm:$0xff]  }
 0x311   :  { %v3177_v45 = vadd.f32 %v1254_v43, %v1250_v0  ;;  %v1255_v47 = vadd.f32 %v1231_v44, %v1227_v42 }
 0x312   :  { %v3179_v48 = vadd.f32 %v1257_v36, %v1253_v1 }
 0x313   :  { %v3181_v16 = vadd.f32 %v1255_v47, %v1251_v10 }
 0x321   :  { %v2225_v49 = vpop.f32.mrb[16].mxu1 }
 0x322   :  { %v1155_v9 = vpop.f32.mrb[17].mxu1  ;;  %v1164_v52 = vadd.f32 %v2225_v49, %v3157_v53 }
 0x323   :  { %v2226_v50 = vpop.f32.mrb[18].mxu1  ;;  %v1156_v11 = vadd.f32 %v3157_v53, %v1155_v9  ;;  %v1315_v9 = vpop.permute.xlu1 %1314 }
 0x324   :  { %v1158_v30 = vpop.f32.mrb[19].mxu1  ;;  %v1167_v32 = vadd.f32 %v2226_v50, %v3157_v53  ;;  %v1236_v19 = vmax.f32 %v1164_v52, 0.0  ;;  %vm1351_vm9 = vcmp.eq.s32.totalorder %v2511_v46, %v1315_v9 }
 0x325   :  { %v1159_v56 = vadd.f32 %v3157_v53, %v1158_v30  ;;  %v1234_v21 = vmax.f32 %v1156_v11, 0.0 }
 0x326   :  { %v1237_v61 = vmax.f32 %v1167_v32, 0.0 }
 0x327   :  { %v1235_v63 = vmax.f32 %v1159_v56, 0.0 }
 0x339   :  { %v2229_v23 = vpop.f32.mrb[20].mxu1 }
 0x33a   :  { %v1180_v54 = vadd.f32 %v2229_v23, %v3157_v53  ;;  %v1171_v55 = vpop.f32.mrb[21].mxu1  ;;  %v1312_v23 = vpop.permute.xlu0 %1311 }
 0x33b   :  { %v1172_v57 = vadd.f32 %v3157_v53, %v1171_v55  ;;  %v2230_v25 = vpop.f32.mrb[22].mxu1  ;;  %vm1350_vm11 = vcmp.eq.s32.totalorder %v2511_v46, %v1312_v23 }
 0x33c   :  { %v1240_v58 = vmax.f32 %v1180_v54, 0.0  ;;  %v1183_v59 = vadd.f32 %v2230_v25, %v3157_v53  ;;  %v1174_v15 = vpop.f32.mrb[23].mxu1  ;;  %v1321_v25 = vpop.permute.xlu1 %1320 }
 0x33d   :  { %v1238_v60 = vmax.f32 %v1172_v57, 0.0  ;;  %v1175_v31 = vadd.f32 %v3157_v53, %v1174_v15  ;;  %vm1353_vm12 = vcmp.eq.s32.totalorder %v2511_v46, %v1321_v25 }
 0x33e   :  { %v1260_v62 = vadd.f32 %v1240_v58, %v1236_v19  ;;  %v1241_v17 = vmax.f32 %v1183_v59, 0.0  ;;  %v1318_v15 = vpop.permute.xlu0 %1317 }
 0x33f   :  { %v1258_v33 = vadd.f32 %v1238_v60, %v1234_v21  ;;  %v1239_v0 = vmax.f32 %v1175_v31, 0.0  ;;  %v1364_v60 = vsel %vm1348_vm10, 1.0, %v2324_v51  ;;  %vm1352_vm14 = vcmp.eq.s32.totalorder %v2511_v46, %v1318_v15  ;;  %v1720_v15 = vld [vmem:[%s3531_s5 + $0x10] sm:$0xff] }
 0x340   :  { %v1261_v26 = vadd.f32 %v1241_v17, %v1237_v61  ;;  %v1366_v61 = vsel %vm1350_vm11, 1.0, %v2324_v51 }
 0x341   :  { %v1259_v1 = vadd.f32 %v1239_v0, %v1235_v63 }
 0x351   :  { %v2233_v10 = vpop.f32.mrb[24].mxu1 }
 0x352   :  { %v1187_v2 = vpop.f32.mrb[25].mxu1  ;;  %v1196_v4 = vadd.f32 %v2233_v10, %v3157_v53 }
 0x353   :  { %v2234_v3 = vpop.f32.mrb[26].mxu1  ;;  %v1188_v13 = vadd.f32 %v3157_v53, %v1187_v2 }
 0x354   :  { %v1190_v28 = vpop.f32.mrb[27].mxu1  ;;  %v1199_v6 = vadd.f32 %v2234_v3, %v3157_v53  ;;  %v1244_v37 = vmax.f32 %v1196_v4, 0.0 }
 0x355   :  { %v1191_v38 = vadd.f32 %v3157_v53, %v1190_v28  ;;  %v1242_v24 = vmax.f32 %v1188_v13, 0.0 }
 0x356   :  { %v1245_v20 = vmax.f32 %v1199_v6, 0.0 }
 0x357   :  { %v1243_v43 = vmax.f32 %v1191_v38, 0.0 }
 0x368   :  { %v2237_v5 = vpop.f32.mrb[28].mxu1 }
 0x369   :  { %v1212_v8 = vadd.f32 %v2237_v5, %v3157_v53  ;;  %v1203_v7 = vpop.f32.mrb[29].mxu1 }
 0x36a   :  { %v1204_v35 = vadd.f32 %v3157_v53, %v1203_v7  ;;  %v2238_v22 = vpop.f32.mrb[30].mxu1 }
 0x36b   :  { %v1248_v18 = vmax.f32 %v1212_v8, 0.0  ;;  %v1215_v39 = vadd.f32 %v2238_v22, %v3157_v53  ;;  %v1206_v27 = vpop.f32.mrb[31].mxu1 }
 0x36c   :  { %v1246_v41 = vmax.f32 %v1204_v35, 0.0  ;;  %v1207_v34 = vadd.f32 %v3157_v53, %v1206_v27  ;;  %v2316_v27 = vld [vmem:[%s3530_s7 + $0x18] sm:$0xff]  }
 0x36d   :  { %v1264_v29 = vadd.f32 %v1248_v18, %v1244_v37  ;;  %v1249_v42 = vmax.f32 %v1215_v39, 0.0  ;;  %v2313_v18 = vld [vmem:[%s3530_s7] sm:$0xff]   ;;  %v2314_v39 = vld [vmem:[%s3530_s7 + $0x8] sm:$0xff]  }
 0x36e   :  { %v1262_v44 = vadd.f32 %v1246_v41, %v1242_v24  ;;  %v1247_v36 = vmax.f32 %v1207_v34, 0.0  ;;  %2259 = vmatprep.subr.bf16.mxu1 %v2313_v18 }
 0x36f   :  { %v1272_v47 = vadd.f32 %v1264_v29, %v1260_v62  ;;  %v1265_v49 = vadd.f32 %v1249_v42, %v1245_v20  ;;  %2260 = vmatpush3.bf16.msra.mxu1 %v2313_v18  ;;  %v2318_v20 = vld [vmem:[%s3530_s7 + $0x28] sm:$0xff]   ;;  %v2319_v42 = vld [vmem:[%s3530_s7 + $0x30] sm:$0xff]  }
 0x370   :  { %v1270_v50 = vadd.f32 %v1262_v44, %v1258_v33  ;;  %v1263_v30 = vadd.f32 %v1247_v36, %v1243_v43  ;;  %v1369_v33 = vsel %vm1353_vm12, 1.0, %v2324_v51  ;;  %2261 = vmatprep.subr.bf16.mxu1 %v2314_v39 }
 0x371   :  { %v1273_v52 = vadd.f32 %v1265_v49, %v1261_v26  ;;  %v1276_v11 = vadd.f32 %v1272_v47, %v3175_v14  ;;  %v1327_v14 = vpop.permute.xlu1 %1326  ;;  %v1368_v26 = vsel %vm1352_vm14, 1.0, %v2324_v51  ;;  %v2320_v47 = vld [vmem:[%s3530_s7 + $0x38] sm:$0xff]  }
 0x372   :  { %v1271_v32 = vadd.f32 %v1263_v30, %v1259_v1  ;;  %v1274_v54 = vadd.f32 %v1270_v50, %v3177_v45  ;;  %v1365_v45 = vsel %vm1349_vm8, 1.0, %v2324_v51  ;;  %vm1355_vm13 = vcmp.eq.s32.totalorder %v2511_v46, %v1327_v14  ;;  %v1721_v14 = vld [vmem:[%s3531_s5 + $0x18] sm:$0xff] }
 0x373   :  { %v1277_v53 = vadd.f32 %v1273_v52, %v3179_v48  ;;  %v1280_v56 = vmul.f32 0.125, %v1276_v11  ;;  %v1367_v48 = vsel %vm1351_vm9, 1.0, %v2324_v51  ;;  %v1379_v31 = vpack.c.bf16 %v1365_v45, %v1364_v60  ;;  %2262 = vmatpush3.bf16.msra.mxu1 %v2314_v39 }
 0x374   :  { %v1275_v55 = vadd.f32 %v1271_v32, %v3181_v16  ;;  %v1278_v19 = vmul.f32 0.125, %v1274_v54  ;;  %v1324_v16 = vpop.permute.xlu0 %1323  ;;  %v1380_v62 = vpack.c.bf16 %v1367_v48, %v1366_v61  ;;  %v1371_v0 = vsel %vm1355_vm13, 1.0, %v2324_v51 }
 0x375   :  { %v1281_v57 = vmul.f32 0.125, %v1277_v53  ;;  %v1333_v17 = vpop.permute.xlu1 %1332  ;;  %vm1354_vm15 = vcmp.eq.s32.totalorder %v2511_v46, %v1324_v16  ;;  %v1381_v1 = vpack.c.bf16 %v1369_v33, %v1368_v26  ;;  %vm1701_vm8 = vcmask 785408  }
 0x376   :  { %v1279_v58 = vmul.f32 0.125, %v1275_v55  ;;  %v1370_v10 = vsel %vm1354_vm15, 1.0, %v2324_v51  ;;  %vm1357_vm0 = vcmp.eq.s32.totalorder %v2511_v46, %v1333_v17 }
 0x377   :  { %v1387_v59 = vpack.c.bf16 %v1281_v57, %v1280_v56  ;;  %v1382_v3 = vpack.c.bf16 %v1371_v0, %v1370_v10  ;;  %v1373_v4 = vsel %vm1357_vm0, 1.0, %v2324_v51 }
 0x378   :  { %v1386_v21 = vpack.c.bf16 %v1279_v58, %v1278_v19  ;;  %v1330_v63 = vpop.permute.xlu0 %1329 }
 0x379   :  { %v1339_v2 = vpop.permute.xlu1 %1338  ;;  %vm1356_vm2 = vcmp.eq.s32.totalorder %v2511_v46, %v1330_v63 }
 0x37a   :  { %2239 = vmatprep.subr.bf16.mxu0 %v1386_v21  ;;  %vm1359_vm1 = vcmp.eq.s32.totalorder %v2511_v46, %v1339_v2  ;;  %v1372_v5 = vsel %vm1356_vm2, 1.0, %v2324_v51  ;;  %v1718_v2 = vld [vmem:[%s3531_s5] sm:$0xff] }
 0x37b   :  { %2240 = vmatpush3.bf16.msra.mxu0 %v1386_v21  ;;  %v1375_v13 = vsel %vm1359_vm1, 1.0, %v2324_v51  ;;  %v1383_v8 = vpack.c.bf16 %v1373_v4, %v1372_v5 }
 0x37c   :  { %2241 = vmatprep.subr.bf16.mxu0 %v1387_v59  ;;  %v1336_v28 = vpop.permute.xlu0 %1335 }
 0x37d   :  { %vm1358_vm5 = vcmp.eq.s32.totalorder %v2511_v46, %v1336_v28  ;;  %v1345_v6 = vpop.permute.xlu1 %1344  ;;  %v1719_v28 = vld [vmem:[%s3531_s5 + $0x8] sm:$0xff] }
 0x37e   :  { %v1374_v7 = vsel %vm1358_vm5, 1.0, %v2324_v51  ;;  %vm1361_vm6 = vcmp.eq.s32.totalorder %v2511_v46, %v1345_v6 }
 0x37f   :  { %2242 = vmatpush3.bf16.msra.mxu0 %v1387_v59  ;;  %v1384_v12 = vpack.c.bf16 %v1375_v13, %v1374_v7  ;;  %v1377_v35 = vsel %vm1361_vm6, 1.0, %v2324_v51 }
 0x380   :  { %2291 = vmatprep.subr.bf16.mxu0 %v2324_v51  ;;  %v1342_v38 = vpop.permute.xlu0 %1341 }
 0x381   :  { %vm1360_vm7 = vcmp.eq.s32.totalorder %v2511_v46, %v1342_v38  ;;  %v2315_v46 = vld [vmem:[%s3530_s7 + $0x10] sm:$0xff]  }
 0x382   :  { %2244 = vmatmul.mubr.msk.bf16.vlgmr.msra.gmra.mrb[32].mxu0 %vm824_vm3, %v1379_v31  ;;  %v1376_v22 = vsel %vm1360_vm7, 1.0, %v2324_v51  ;;  %2263 = vmatprep.subr.bf16.mxu1 %v2315_v46 }
 0x383   :  { %2247 = vmatprep.mubr.msk.bf16.mxu0 %vm824_vm3, %v1380_v62  ;;  %v1385_v37 = vpack.c.bf16 %v1377_v35, %v1376_v22  ;;  %2264 = vmatpush3.bf16.msra.mxu1 %v2315_v46 }
 0x384   :  { %2265 = vmatprep.subr.bf16.mxu1 %v2316_v27 }
 0x387   :  { %2266 = vmatpush3.bf16.msra.mxu1 %v2316_v27  ;;  %v1724_v27 = vld [vmem:[%s3531_s5 + $0x30] sm:$0xff] }
 0x388   :  { %2267 = vmatprep.subr.bf16.mxu1 %v2317_v40 }
 0x38a   :  { %2248 = vmatmul.mubr.msk.bf16.gmra.mrb[36].mxu0 %vm824_vm3, %v1381_v1 }
 0x38b   :  { %2251 = vmatprep.mubr.msk.bf16.mxu0 %vm824_vm3, %v1382_v3  ;;  %2268 = vmatpush3.bf16.msra.mxu1 %v2317_v40 }
 0x38c   :  { %2269 = vmatprep.subr.bf16.mxu1 %v2318_v20 }
 0x38f   :  { %2270 = vmatpush3.bf16.msra.mxu1 %v2318_v20 }
 0x390   :  { %2271 = vmatprep.subr.bf16.mxu1 %v2319_v42 }
 0x392   :  { %2252 = vmatmul.mubr.msk.bf16.gmra.mrb[40].mxu0 %vm824_vm3, %v1383_v8 }
 0x393   :  { %2255 = vmatprep.mubr.msk.bf16.mxu0 %vm824_vm3, %v1384_v12  ;;  %2272 = vmatpush3.bf16.msra.mxu1 %v2319_v42 }
 0x394   :  { %2273 = vmatprep.subr.bf16.mxu1 %v2320_v47 }
 0x397   :  { %2274 = vmatpush3.bf16.msra.mxu1 %v2320_v47 }
 0x39a   :  { %2256 = vmatmul.mubr.msk.bf16.gmra.mrb[44].mxu0 %vm824_vm3, %v1385_v37 }
 0x455   :  { %v3254_v24 = vpop.f32.mrb[32].mxu0 }
 0x456   :  { %1529 = vrot.lane.b32.xlu0 %v3254_v24, %s2326_s0  ;;  %v3258_v41 = vpop.f32.mrb[33].mxu0 }
 0x457   :  { %v3260_v34 = vpop.f32.mrb[34].mxu0 }
 0x458   :  { %1531 = vrot.lane.b32.xlu1 %v3260_v34, %s2326_s0  ;;  %v3267_v29 = vpop.f32.mrb[35].mxu0 }
 0x45a   :  { %1577 = vrot.lane.b32.xlu0 %v3254_v24, %s2328_s20 }
 0x45c   :  { %1579 = vrot.lane.b32.xlu1 %v3260_v34, %s2328_s20 }
 0x45d   :  { %v3276_v43 = vpop.f32.mrb[36].mxu0 }
 0x45e   :  { %1625 = vrot.lane.b32.xlu0 %v3254_v24, %s2329_s13  ;;  %v3280_v44 = vpop.f32.mrb[37].mxu0 }
 0x45f   :  { %v3282_v36 = vpop.f32.mrb[38].mxu0 }
 0x460   :  { %1627 = vrot.lane.b32.xlu1 %v3260_v34, %s2329_s13  ;;  %v3289_v49 = vpop.f32.mrb[39].mxu0 }
 0x462   :  { %1525 = vrot.lane.b32.xlu0 %v3258_v41, %s2326_s0 }
 0x464   :  { %1527 = vrot.lane.b32.xlu1 %v3267_v29, %s2326_s0 }
 0x465   :  { %v3295_v9 = vpop.f32.mrb[40].mxu0 }
 0x466   :  { %1573 = vrot.lane.b32.xlu0 %v3258_v41, %s2328_s20  ;;  %v3299_v50 = vpop.f32.mrb[41].mxu0 }
 0x467   :  { %v3301_v30 = vpop.f32.mrb[42].mxu0 }
 0x468   :  { %1575 = vrot.lane.b32.xlu1 %v3267_v29, %s2328_s20  ;;  %v3305_v52 = vpop.f32.mrb[43].mxu0 }
 0x46a   :  { %1621 = vrot.lane.b32.xlu0 %v3258_v41, %s2329_s13 }
 0x46c   :  { %1623 = vrot.lane.b32.xlu1 %v3267_v29, %s2329_s13 }
 0x46d   :  { %v3311_v11 = vpop.f32.mrb[44].mxu0 }
 0x46e   :  { %1537 = vrot.lane.b32.xlu0 %v3276_v43, %s2326_s0  ;;  %v3315_v23 = vpop.f32.mrb[45].mxu0 }
 0x46f   :  { %v3317_v32 = vpop.f32.mrb[46].mxu0 }
 0x470   :  { %1539 = vrot.lane.b32.xlu1 %v3282_v36, %s2326_s0  ;;  %v3321_v54 = vpop.f32.mrb[47].mxu0 }
 0x472   :  { %1585 = vrot.lane.b32.xlu0 %v3276_v43, %s2328_s20 }
 0x474   :  { %1587 = vrot.lane.b32.xlu1 %v3282_v36, %s2328_s20 }
 0x476   :  { %1633 = vrot.lane.b32.xlu0 %v3276_v43, %s2329_s13 }
 0x478   :  { %1635 = vrot.lane.b32.xlu1 %v3282_v36, %s2329_s13 }
 0x47a   :  { %1533 = vrot.lane.b32.xlu0 %v3280_v44, %s2326_s0 }
 0x47c   :  { %1535 = vrot.lane.b32.xlu1 %v3289_v49, %s2326_s0 }
 0x47e   :  { %1581 = vrot.lane.b32.xlu0 %v3280_v44, %s2328_s20 }
 0x480   :  { %1583 = vrot.lane.b32.xlu1 %v3289_v49, %s2328_s20 }
 0x482   :  { %1629 = vrot.lane.b32.xlu0 %v3280_v44, %s2329_s13 }
 0x484   :  { %1631 = vrot.lane.b32.xlu1 %v3289_v49, %s2329_s13 }
 0x486   :  { %1545 = vrot.lane.b32.xlu0 %v3295_v9, %s2326_s0 }
 0x488   :  { %1547 = vrot.lane.b32.xlu1 %v3301_v30, %s2326_s0 }
 0x48a   :  { %1593 = vrot.lane.b32.xlu0 %v3295_v9, %s2328_s20 }
 0x48c   :  { %1595 = vrot.lane.b32.xlu1 %v3301_v30, %s2328_s20 }
 0x48e   :  { %1641 = vrot.lane.b32.xlu0 %v3295_v9, %s2329_s13 }
 0x490   :  { %1643 = vrot.lane.b32.xlu1 %v3301_v30, %s2329_s13 }
 0x492   :  { %1541 = vrot.lane.b32.xlu0 %v3299_v50, %s2326_s0 }
 0x494   :  { %1543 = vrot.lane.b32.xlu1 %v3305_v52, %s2326_s0 }
 0x496   :  { %1589 = vrot.lane.b32.xlu0 %v3299_v50, %s2328_s20 }
 0x498   :  { %1591 = vrot.lane.b32.xlu1 %v3305_v52, %s2328_s20 }
 0x49a   :  { %1637 = vrot.lane.b32.xlu0 %v3299_v50, %s2329_s13 }
 0x49c   :  { %1639 = vrot.lane.b32.xlu1 %v3305_v52, %s2329_s13 }
 0x49e   :  { %1553 = vrot.lane.b32.xlu0 %v3311_v11, %s2326_s0 }
 0x4a0   :  { %1555 = vrot.lane.b32.xlu1 %v3317_v32, %s2326_s0 }
 0x4a2   :  { %1601 = vrot.lane.b32.xlu0 %v3311_v11, %s2328_s20 }
 0x4a4   :  { %1603 = vrot.lane.b32.xlu1 %v3317_v32, %s2328_s20 }
 0x4a6   :  { %1549 = vrot.lane.b32.xlu0 %v3315_v23, %s2326_s0 }
 0x4a8   :  { %1551 = vrot.lane.b32.xlu1 %v3321_v54, %s2326_s0 }
 0x4aa   :  { %1597 = vrot.lane.b32.xlu0 %v3315_v23, %s2328_s20 }
 0x4ac   :  { %1599 = vrot.lane.b32.xlu1 %v3321_v54, %s2328_s20 }
 0x4ae   :  { %1645 = vrot.lane.b32.xlu0 %v3315_v23, %s2329_s13 }
 0x4b0   :  { %1647 = vrot.lane.b32.xlu1 %v3321_v54, %s2329_s13 }
 0x4b2   :  { %1649 = vrot.lane.b32.xlu0 %v3311_v11, %s2329_s13 }
 0x4b4   :  { %1651 = vrot.lane.b32.xlu1 %v3317_v32, %s2329_s13 }
 0x4c8   :  { %v1530_v53 = vpop.permute.xlu0 %1529 }
 0x4c9   :  { %v1671_v25 = vsel %vm824_vm3, %v3254_v24, %v1530_v53  ;;  %v1725_v24 = vld [vmem:[%s3531_s5 + $0x38] sm:$0xff] }
 0x4ca   :  { %v1532_v55 = vpop.permute.xlu1 %1531 }
 0x4cb   :  { %v1672_v59 = vsel %vm824_vm3, %v3260_v34, %v1532_v55 }
 0x4cc   :  { %v1578_v56 = vpop.permute.xlu0 %1577 }
 0x4cd   :  { %v1687_v19 = vsel %vm261_vm4, %v1671_v25, %v1578_v56 }
 0x4ce   :  { %v1580_v57 = vpop.permute.xlu1 %1579 }
 0x4cf   :  { %v1688_v45 = vsel %vm261_vm4, %v1672_v59, %v1580_v57 }
 0x4d0   :  { %v1626_v58 = vpop.permute.xlu0 %1625 }
 0x4d1   :  { %v1704_v21 = vsel %vm1701_vm8, %v1687_v19, %v1626_v58  ;;  %v1722_v58 = vld [vmem:[%s3531_s5 + $0x20] sm:$0xff] }
 0x4d2   :  { %v1628_v48 = vpop.permute.xlu1 %1627  ;;  %v1736_v60 = vmul.f32 %v1720_v15, %v1704_v21  ;;  %v1723_v15 = vld [vmem:[%s3531_s5 + $0x28] sm:$0xff] }
 0x4d3   :  { %v1705_v16 = vsel %vm1701_vm8, %v1688_v45, %v1628_v48 }
 0x4d4   :  { %v1737_v31 = vmul.f32 %v1721_v14, %v1705_v16  ;;  %v1526_v61 = vpop.permute.xlu0 %1525 }
 0x4d5   :  { %v1669_v0 = vsel %vm824_vm3, %v3258_v41, %v1526_v61 }
 0x4d6   :  { %v1751_v62 = vpack.c.bf16 %v1737_v31, %v1736_v60  ;;  %v1528_v17 = vpop.permute.xlu1 %1527 }
 0x4d7   :  { %v1670_v10 = vsel %vm824_vm3, %v3267_v29, %v1528_v17 }
 0x4d8   :  { %v1574_v63 = vpop.permute.xlu0 %1573 }
 0x4d9   :  { %v1685_v26 = vsel %vm261_vm4, %v1669_v0, %v1574_v63  ;;  %v1728_v0 = vld [vmem:[%s3531_s5 + $0x50] sm:$0xff] }
 0x4da   :  { %v1576_v33 = vpop.permute.xlu1 %1575 }
 0x4db   :  { %v1686_v4 = vsel %vm261_vm4, %v1670_v10, %v1576_v33 }
 0x4dc   :  { %v1622_v1 = vpop.permute.xlu0 %1621 }
 0x4dd   :  { %v1702_v3 = vsel %vm1701_vm8, %v1685_v26, %v1622_v1  ;;  %v1729_v1 = vld [vmem:[%s3531_s5 + $0x58] sm:$0xff] }
 0x4de   :  { %v1624_v13 = vpop.permute.xlu1 %1623  ;;  %v1734_v6 = vmul.f32 %v1718_v2, %v1702_v3 }
 0x4df   :  { %v1703_v5 = vsel %vm1701_vm8, %v1686_v4, %v1624_v13 }
 0x4e0   :  { %v1735_v8 = vmul.f32 %v1719_v28, %v1703_v5  ;;  %v1538_v7 = vpop.permute.xlu0 %1537 }
 0x4e1   :  { %v1675_v37 = vsel %vm824_vm3, %v3276_v43, %v1538_v7 }
 0x4e2   :  { %v1540_v12 = vpop.permute.xlu1 %1539  ;;  %v1750_v38 = vpack.c.bf16 %v1735_v8, %v1734_v6 }
 0x4e3   :  { %v1676_v46 = vsel %vm824_vm3, %v3282_v36, %v1540_v12 }
 0x4e4   :  { %v1586_v35 = vpop.permute.xlu0 %1585  ;;  %2275 = vmatprep.mubr.bf16.mxu1 %v1750_v38 }
 0x4e5   :  { %2276 = vmatmul.mubr.bf16.vlgmr.msra.gmra.mrb[32].mxu1 %v1751_v62  ;;  %v1691_v18 = vsel %vm261_vm4, %v1675_v37, %v1586_v35  ;;  %v1726_v35 = vld [vmem:[%s3531_s5 + $0x40] sm:$0xff]  ;;  %v1727_v37 = vld [vmem:[%s3531_s5 + $0x48] sm:$0xff] }
 0x4e6   :  { %v1588_v22 = vpop.permute.xlu1 %1587 }
 0x4e7   :  { %v1692_v41 = vsel %vm261_vm4, %v1676_v46, %v1588_v22 }
 0x4e8   :  { %v1634_v39 = vpop.permute.xlu0 %1633 }
 0x4e9   :  { %v1708_v40 = vsel %vm1701_vm8, %v1691_v18, %v1634_v39 }
 0x4ea   :  { %v1636_v34 = vpop.permute.xlu1 %1635  ;;  %v1740_v29 = vmul.f32 %v1724_v27, %v1708_v40 }
 0x4eb   :  { %v1709_v20 = vsel %vm1701_vm8, %v1692_v41, %v1636_v34 }
 0x4ec   :  { %v1741_v42 = vmul.f32 %v1725_v24, %v1709_v20  ;;  %v1534_v43 = vpop.permute.xlu0 %1533 }
 0x4ed   :  { %v1673_v56 = vsel %vm824_vm3, %v3280_v44, %v1534_v43 }
 0x4ee   :  { %v1536_v47 = vpop.permute.xlu1 %1535  ;;  %v1753_v36 = vpack.c.bf16 %v1741_v42, %v1740_v29 }
 0x4ef   :  { %v1674_v19 = vsel %vm824_vm3, %v3289_v49, %v1536_v47 }
 0x4f0   :  { %v1582_v53 = vpop.permute.xlu0 %1581 }
 0x4f1   :  { %v1689_v57 = vsel %vm261_vm4, %v1673_v56, %v1582_v53  ;;  %v1730_v56 = vld [vmem:[%s3531_s5 + $0x60] sm:$0xff] }
 0x4f2   :  { %v1584_v55 = vpop.permute.xlu1 %1583 }
 0x4f3   :  { %v1690_v21 = vsel %vm261_vm4, %v1674_v19, %v1584_v55 }
 0x4f4   :  { %v1630_v25 = vpop.permute.xlu0 %1629 }
 0x4f5   :  { %v1706_v59 = vsel %vm1701_vm8, %v1689_v57, %v1630_v25  ;;  %v1731_v25 = vld [vmem:[%s3531_s5 + $0x68] sm:$0xff] }
 0x4f6   :  { %v1632_v14 = vpop.permute.xlu1 %1631  ;;  %v1738_v45 = vmul.f32 %v1722_v58, %v1706_v59 }
 0x4f7   :  { %v1707_v44 = vsel %vm1701_vm8, %v1690_v21, %v1632_v14 }
 0x4f8   :  { %v1739_v48 = vmul.f32 %v1723_v15, %v1707_v44  ;;  %v1546_v16 = vpop.permute.xlu0 %1545 }
 0x4f9   :  { %v1679_v62 = vsel %vm824_vm3, %v3295_v9, %v1546_v16 }
 0x4fa   :  { %v1548_v60 = vpop.permute.xlu1 %1547  ;;  %v1752_v49 = vpack.c.bf16 %v1739_v48, %v1738_v45  ;;  %v1732_v45 = vld [vmem:[%s3531_s5 + $0x70] sm:$0xff] }
 0x4fb   :  { %v1680_v33 = vsel %vm824_vm3, %v3301_v30, %v1548_v60 }
 0x4fc   :  { %v1594_v31 = vpop.permute.xlu0 %1593  ;;  %2279 = vmatprep.mubr.bf16.mxu1 %v1752_v49 }
 0x4fd   :  { %2280 = vmatmul.mubr.bf16.gmra.mrb[36].mxu1 %v1753_v36  ;;  %v1695_v17 = vsel %vm261_vm4, %v1679_v62, %v1594_v31 }
 0x4fe   :  { %v1596_v61 = vpop.permute.xlu1 %1595 }
 0x4ff   :  { %v1696_v10 = vsel %vm261_vm4, %v1680_v33, %v1596_v61  ;;  %v2077_v33 = vld [vmem:[%s3533_s8] ss:$0 sm:$0xff] }
 0x500   :  { %v1642_v63 = vpop.permute.xlu0 %1641 }
 0x501   :  { %v1712_v26 = vsel %vm1701_vm8, %v1695_v17, %v1642_v63  ;;  %v2321_v17 = vld [vmem:[%s3532_s9] sm:$0xff]   ;;  %v2322_v63 = vld [vmem:[%s3532_s9 + $0x8] sm:$0xff]  }
 0x502   :  { %v1644_v2 = vpop.permute.xlu1 %1643  ;;  %v1744_v3 = vmul.f32 %v1728_v0, %v1712_v26  ;;  %2292 = vmatpush3.bf16.msra.mxu0 %v2321_v17 }
 0x503   :  { %v1713_v9 = vsel %vm1701_vm8, %v1696_v10, %v1644_v2  ;;  %2293 = vmatprep.subr.bf16.mxu0 %v2324_v51 }
 0x504   :  { %v1745_v28 = vmul.f32 %v1729_v1, %v1713_v9  ;;  %v1542_v4 = vpop.permute.xlu0 %1541 }
 0x505   :  { %v1677_v8 = vsel %vm824_vm3, %v3299_v50, %v1542_v4 }
 0x506   :  { %v1544_v13 = vpop.permute.xlu1 %1543  ;;  %v1755_v30 = vpack.c.bf16 %v1745_v28, %v1744_v3  ;;  %2294 = vmatpush3.bf16.msra.mxu0 %v2322_v63 }
 0x507   :  { %v1678_v38 = vsel %vm824_vm3, %v3305_v52, %v1544_v13 }
 0x508   :  { %v1590_v5 = vpop.permute.xlu0 %1589 }
 0x509   :  { %v1693_v7 = vsel %vm261_vm4, %v1677_v8, %v1590_v5 }
 0x50a   :  { %v1592_v6 = vpop.permute.xlu1 %1591 }
 0x50b   :  { %v1694_v18 = vsel %vm261_vm4, %v1678_v38, %v1592_v6 }
 0x50c   :  { %v1638_v12 = vpop.permute.xlu0 %1637 }
 0x50d   :  { %v1710_v22 = vsel %vm1701_vm8, %v1693_v7, %v1638_v12 }
 0x50e   :  { %v1640_v39 = vpop.permute.xlu1 %1639  ;;  %v1742_v46 = vmul.f32 %v1726_v35, %v1710_v22 }
 0x50f   :  { %v1711_v50 = vsel %vm1701_vm8, %v1694_v18, %v1640_v39 }
 0x510   :  { %v1743_v27 = vmul.f32 %v1727_v37, %v1711_v50  ;;  %v1554_v40 = vpop.permute.xlu0 %1553 }
 0x512   :  { %v1556_v24 = vpop.permute.xlu1 %1555  ;;  %v1754_v52 = vpack.c.bf16 %v1743_v27, %v1742_v46 }
 0x513   :  { %v1684_v44 = vsel %vm824_vm3, %v3317_v32, %v1556_v24 }
 0x514   :  { %v1602_v41 = vpop.permute.xlu0 %1601  ;;  %2283 = vmatprep.mubr.bf16.mxu1 %v1754_v52 }
 0x515   :  { %2284 = vmatmul.mubr.bf16.gmra.mrb[40].mxu1 %v1755_v30 }
 0x516   :  { %v1604_v34 = vpop.permute.xlu1 %1603 }
 0x517   :  { %v1700_v16 = vsel %vm261_vm4, %v1684_v44, %v1604_v34 }
 0x518   :  { %v1550_v20 = vpop.permute.xlu0 %1549 }
 0x519   :  { %v1681_v47 = vsel %vm824_vm3, %v3315_v23, %v1550_v20  ;;  %v1683_v23 = vsel %vm824_vm3, %v3311_v11, %v1554_v40  ;;  %v1733_v11 = vld [vmem:[%s3531_s5 + $0x78] sm:$0xff] }
 0x51a   :  { %v1552_v29 = vpop.permute.xlu1 %1551 }
 0x51b   :  { %v1682_v55 = vsel %vm824_vm3, %v3321_v54, %v1552_v29  ;;  %v1699_v54 = vsel %vm261_vm4, %v1683_v23, %v1602_v41 }
 0x51c   :  { %v1598_v42 = vpop.permute.xlu0 %1597 }
 0x51d   :  { %v1697_v36 = vsel %vm261_vm4, %v1681_v47, %v1598_v42 }
 0x51e   :  { %v1600_v43 = vpop.permute.xlu1 %1599 }
 0x51f   :  { %v1698_v19 = vsel %vm261_vm4, %v1682_v55, %v1600_v43  ;;  %vm2330_vm4 = vmmov 0  }
 0x520   :  { %v1646_v53 = vpop.permute.xlu0 %1645  ;;  %2295 = vmatprep.mubr.msk.bf16.mxu0 %vm2330_vm4, %v2324_v51 }
 0x521   :  { %v1714_v57 = vsel %vm1701_vm8, %v1697_v36, %v1646_v53 }
 0x522   :  { %v1648_v58 = vpop.permute.xlu1 %1647  ;;  %v1746_v15 = vmul.f32 %v1730_v56, %v1714_v57 }
 0x523   :  { %v1715_v59 = vsel %vm1701_vm8, %v1698_v19, %v1648_v58 }
 0x524   :  { %v1747_v21 = vmul.f32 %v1731_v25, %v1715_v59  ;;  %v1650_v14 = vpop.permute.xlu0 %1649 }
 0x525   :  { %v1716_v48 = vsel %vm1701_vm8, %v1699_v54, %v1650_v14 }
 0x526   :  { %v1652_v60 = vpop.permute.xlu1 %1651  ;;  %v1756_v49 = vpack.c.bf16 %v1747_v21, %v1746_v15  ;;  %v1748_v61 = vmul.f32 %v1732_v45, %v1716_v48 }
 0x527   :  { %v1717_v31 = vsel %vm1701_vm8, %v1700_v16, %v1652_v60 }
 0x528   :  { %v1749_v62 = vmul.f32 %v1733_v11, %v1717_v31  ;;  %2287 = vmatprep.mubr.bf16.mxu1 %v1756_v49 }
 0x52a   :  { %v1757_v32 = vpack.c.bf16 %v1749_v62, %v1748_v61 }
 0x52c   :  { %2288 = vmatmul.mubr.bf16.gmra.mrb[44].mxu1 %v1757_v32 }
 0x5b8   :  { %v2277_v0 = vpop.f32.mrb[32].mxu1 }
 0x5b9   :  { %v1872_v26 = vadd.f32 %v2277_v0, %v2077_v33  ;;  %v1863_v1 = vpop.f32.mrb[33].mxu1 }
 0x5ba   :  { %v1864_v10 = vadd.f32 %v2077_v33, %v1863_v1  ;;  %v2278_v2 = vpop.f32.mrb[34].mxu1  ;;  %v2086_v1 = vld [vmem:[%s3534_s10] ss:$0 sm:$0xff] }
 0x5bb   :  { %v1928_v9 = vmax.f32 %v1872_v26, 0.0  ;;  %v1875_v3 = vadd.f32 %v2278_v2, %v2077_v33  ;;  %v1866_v28 = vpop.f32.mrb[35].mxu1 }
 0x5bc   :  { %v1926_v4 = vmax.f32 %v1864_v10, 0.0  ;;  %v1867_v13 = vadd.f32 %v2077_v33, %v1866_v28 }
 0x5bd   :  { %v1929_v30 = vmax.f32 %v1875_v3, 0.0 }
 0x5be   :  { %v1942_v5 = vadd.f32 %v1928_v9, %v1926_v4  ;;  %v1927_v6 = vmax.f32 %v1867_v13, 0.0 }
 0x5c0   :  { %v1943_v8 = vadd.f32 %v1929_v30, %v1927_v6 }
 0x5d0   :  { %v2281_v7 = vpop.f32.mrb[36].mxu1 }
 0x5d1   :  { %v1888_v51 = vadd.f32 %v2281_v7, %v2077_v33  ;;  %v1879_v12 = vpop.f32.mrb[37].mxu1 }
 0x5d2   :  { %v1880_v38 = vadd.f32 %v2077_v33, %v1879_v12  ;;  %v2282_v35 = vpop.f32.mrb[38].mxu1 }
 0x5d3   :  { %v1932_v22 = vmax.f32 %v1888_v51, 0.0  ;;  %v1891_v37 = vadd.f32 %v2282_v35, %v2077_v33  ;;  %v1882_v18 = vpop.f32.mrb[39].mxu1 }
 0x5d4   :  { %v1930_v39 = vmax.f32 %v1880_v38, 0.0  ;;  %v1883_v50 = vadd.f32 %v2077_v33, %v1882_v18 }
 0x5d5   :  { %v1933_v46 = vmax.f32 %v1891_v37, 0.0 }
 0x5d6   :  { %v1944_v27 = vadd.f32 %v1932_v22, %v1930_v39  ;;  %v1931_v40 = vmax.f32 %v1883_v50, 0.0 }
 0x5d8   :  { %v1950_v24 = vadd.f32 %v1944_v27, %v1942_v5  ;;  %v1945_v52 = vadd.f32 %v1933_v46, %v1931_v40 }
 0x5da   :  { %v1951_v41 = vadd.f32 %v1945_v52, %v1943_v8 }
 0x5e8   :  { %v2285_v34 = vpop.f32.mrb[40].mxu1 }
 0x5e9   :  { %v1904_v20 = vadd.f32 %v2285_v34, %v2077_v33  ;;  %v1895_v29 = vpop.f32.mrb[41].mxu1 }
 0x5ea   :  { %v1896_v42 = vadd.f32 %v2077_v33, %v1895_v29  ;;  %v2286_v43 = vpop.f32.mrb[42].mxu1 }
 0x5eb   :  { %v1936_v47 = vmax.f32 %v1904_v20, 0.0  ;;  %v1907_v36 = vadd.f32 %v2286_v43, %v2077_v33  ;;  %v1898_v53 = vpop.f32.mrb[43].mxu1 }
 0x5ec   :  { %v1934_v55 = vmax.f32 %v1896_v42, 0.0  ;;  %v1899_v56 = vadd.f32 %v2077_v33, %v1898_v53 }
 0x5ed   :  { %v1937_v57 = vmax.f32 %v1907_v36, 0.0 }
 0x5ee   :  { %v1946_v25 = vadd.f32 %v1936_v47, %v1934_v55  ;;  %v1935_v19 = vmax.f32 %v1899_v56, 0.0 }
 0x5f0   :  { %v1947_v58 = vadd.f32 %v1937_v57, %v1935_v19 }
 0x5ff   :  { %v2289_v23 = vpop.f32.mrb[44].mxu1 }
 0x600   :  { %v1920_v59 = vadd.f32 %v2289_v23, %v2077_v33  ;;  %v1911_v54 = vpop.f32.mrb[45].mxu1 }
 0x601   :  { %v1912_v15 = vadd.f32 %v2077_v33, %v1911_v54  ;;  %v2290_v21 = vpop.f32.mrb[46].mxu1 }
 0x602   :  { %v1940_v14 = vmax.f32 %v1920_v59, 0.0  ;;  %v1923_v44 = vadd.f32 %v2290_v21, %v2077_v33  ;;  %v1914_v45 = vpop.f32.mrb[47].mxu1 }
 0x603   :  { %v1938_v48 = vmax.f32 %v1912_v15, 0.0  ;;  %v1915_v11 = vadd.f32 %v2077_v33, %v1914_v45 }
 0x604   :  { %v1941_v16 = vmax.f32 %v1923_v44, 0.0 }
 0x605   :  { %v1948_v60 = vadd.f32 %v1940_v14, %v1938_v48  ;;  %v1939_v49 = vmax.f32 %v1915_v11, 0.0 }
 0x607   :  { %v1952_v31 = vadd.f32 %v1948_v60, %v1946_v25  ;;  %v1949_v61 = vadd.f32 %v1941_v16, %v1939_v49 }
 0x609   :  { %v1954_v62 = vadd.f32 %v1952_v31, %v1950_v24  ;;  %v1953_v32 = vadd.f32 %v1949_v61, %v1947_v58 }
 0x60b   :  { %v1955_v17 = vadd.f32 %v1953_v32, %v1951_v41  ;;  %v1956_v63 = vmul.f32 0.125, %v1954_v62 }
 0x60d   :  { %v1957_v0 = vmul.f32 0.125, %v1955_v17 }
 0x60f   :  { %v1958_v26 = vpack.c.bf16 %v1957_v0, %v1956_v63 }
 0x611   :  { %2296 = vmatmul.mubr.msk.bf16.vlgmr.msra.gmra.mrb[48].mxu0 %vm824_vm3, %v1958_v26 }
 0x6e4   :  { %v2019_v10 = vpop.f32.mrb[48].mxu0 }
 0x6e5   :  { %v2020_v2 = vadd.f32 %v2086_v1, %v2019_v10  ;;  %v2297_v33 = vpop.f32.mrb[49].mxu0 }
 0x6e6   :  { %v2022_v9 = vpop.f32.mrb[50].mxu0 }
 0x6e7   :  { %2026 = vst [vmem:[%s3535_s11] sm:$0xff] %v2020_v2  ;;  %v2023_v3 = vadd.f32 %v2086_v1, %v2022_v9  ;;  %v2298_v28 = vpop.f32.mrb[51].mxu0 }
 0x6e9   :  { %2027 = vst [vmem:[%s3535_s11 + $0x8] sm:$0xff] %v2023_v3 }

</bundles_post_ra>
